<compile_context>
chip_gen: v7x
topology: tpu7x:2x2x1
jax: 0.10.0
libtpu: 0.0.40
codegen_flags: <defaults>
</compile_context>

<pallas_src>
import math
import functools

import numpy as np
import jax
import jax.numpy as jnp
from jax.experimental import pallas as pl
from jax.experimental.pallas import tpu as pltpu


# ---------------------------------------------------------------------------
# In-kernel helpers
# ---------------------------------------------------------------------------
def _layernorm(x, g, b, eps=1e-5):
    mu = jnp.mean(x, axis=-1, keepdims=True)
    var = jnp.mean((x - mu) ** 2, axis=-1, keepdims=True)
    return (x - mu) * jax.lax.rsqrt(var + eps) * g + b


def _erf_f32(x):
    # Abramowitz & Stegun 7.1.26 rational approximation, max abs err ~1.5e-7
    # (~1 f32 ulp) — matches exact-erf GELU at float32 precision.
    sign = jnp.where(x >= 0.0, 1.0, -1.0)
    ax = jnp.abs(x)
    t = 1.0 / (1.0 + 0.3275911 * ax)
    poly = t * (0.254829592
                + t * (-0.284496736
                       + t * (1.421413741
                              + t * (-1.453152027 + t * 1.061405429))))
    return sign * (1.0 - poly * jnp.exp(-ax * ax))


def _gelu_exact(x):
    return 0.5 * x * (1.0 + _erf_f32(x * (1.0 / math.sqrt(2.0))))


def _fast_recip(x):
    # EUP approximate reciprocal + one Newton step.  Safe: softmax max-subtraction
    # guarantees the denominator >= 1 (keep the max-subtraction if refactoring).
    r = pl.reciprocal(x, approx=True)
    return r * (2.0 - x * r)


# ---------------------------------------------------------------------------
# Fused kernel: one (Nb, L, E) batch block per grid step, `layers` iterations inside.
# ---------------------------------------------------------------------------
def _fusion_kernel(heads, layers, use_bf16,
                   q_ref, k_ref, v_ref,
                   g1_ref, b1_ref, g2_ref, b2_ref,
                   wq_ref, wk_ref, wv_ref, bq_ref, bk_ref, bv_ref,
                   wo_ref, bo_ref, w1_ref, bm1_ref, w2_ref, bm2_ref,
                   o_ref,
                   ctx_ref):
    Nb, L, E = q_ref.shape
    S = k_ref.shape[1]
    hd = E // heads
    M, MS = Nb * L, Nb * S

    mm_dtype = jnp.bfloat16 if use_bf16 else jnp.float32

    def mm(a, w):
        return jnp.dot(a.astype(mm_dtype), w, preferred_element_type=jnp.float32)

    # ---- hoisted parameter loads (weights arrive already in mm_dtype) ----
    g1, b1 = g1_ref[...], b1_ref[...]
    g2, b2 = g2_ref[...], b2_ref[...]
    bq, bk, bv, bo = bq_ref[...], bk_ref[...], bv_ref[...], bo_ref[...]
    bm1, bm2 = bm1_ref[...], bm2_ref[...]
    Wq, Wk, Wv, Wo = wq_ref[...], wk_ref[...], wv_ref[...], wo_ref[...]
    W1, W2 = w1_ref[...], w2_ref[...]

    # (Nb, L, E) -> (Nb*L, E): leading-dim collapse (E stays the lane dim; free for L % 8 == 0)
    q = q_ref[...].reshape(M, E)
    k = k_ref[...].reshape(MS, E)
    v = v_ref[...].reshape(MS, E)

    # `layers` is tiny (2) so an unrolled Python loop is fine.
    for _ in range(layers):
        # shared LayerNorm1 on q, k, v (normalized k/v state carried to the next layer)
        qn = _layernorm(q, g1, b1)
        kn = _layernorm(k, g1, b1)
        vn = _layernorm(v, g1, b1)
        k, v = kn, vn

        # batch-stacked input projections (big-M MXU GEMMs); 1/sqrt(hd) folded into Wq/bq
        qp = mm(qn, Wq) + bq
        kp = mm(kn, Wk) + bk
        vp = mm(vn, Wv) + bv

        # attention: per head, one batched-over-Nb contraction for QK^T and one for PV.
        for h in range(heads):
            lo = h * hd
            qh = qp[:, lo:lo + hd].reshape(Nb, L, hd).astype(mm_dtype)
            kh = kp[:, lo:lo + hd].reshape(Nb, S, hd).astype(mm_dtype)
            vh = vp[:, lo:lo + hd].reshape(Nb, S, hd).astype(mm_dtype)
            # scores: (Nb, L, S), contract hd, batch over Nb
            s = jax.lax.dot_general(qh, kh, (((2,), (2,)), ((0,), (0,))),
                                    preferred_element_type=jnp.float32)
            s = s - jnp.max(s, axis=-1, keepdims=True)
            p = jnp.exp(s)
            p = p * _fast_recip(jnp.sum(p, axis=-1, keepdims=True))
            # context: (Nb, L, hd), batch over Nb
            ctxh = jax.lax.dot_general(p.astype(mm_dtype), vh,
                                       (((2,), (1,)), ((0,), (0,))),
                                       preferred_element_type=jnp.float32)
            ctx_ref[:, lo:lo + hd] = ctxh.reshape(M, hd).astype(ctx_ref.dtype)

        # single output projection over all rows and all heads
        attn = mm(ctx_ref[...], Wo) + bo
        q = qn + attn                      # residual on the *normalized* query (PyTorch semantics)

        # MLP block (residual path stays f32)
        qn2 = _layernorm(q, g2, b2)
        h1 = _gelu_exact(mm(qn2, W1) + bm1)
        q = q + mm(h1, W2) + bm2

    # lane-dense writeback of the whole (Nb, L, E) block
    o_ref[...] = q.reshape(Nb, L, E).astype(o_ref.dtype)


# ---------------------------------------------------------------------------
# Wrapper helpers (generation-aware VMEM budget / batch block)
# ---------------------------------------------------------------------------
def _vmem_capacity_bytes():
    try:
        info = pltpu.get_tpu_info()
        for attr in ("vmem_capacity_bytes", "vmem_size_bytes", "vmem_bytes"):
            cap = getattr(info, attr, None)
            if cap:
                return int(cap)
    except Exception:
        pass
    return 64 * 1024 * 1024   # conservative fallback (v7x per-core VMEM)


def _auto_batch_block(N, L, S, E, ctx_itemsize, weight_bytes, act_budget, min_grid=2):
    """Largest divisor of N whose block fits the activation budget; keeps >= min_grid
    grid steps when N allows (v7x has 2 TensorCores; near-free elsewhere)."""
    per_batch = (
        4 * E * 2 * (2 * L + 2 * S)          # double-buffered q/k/v input + output blocks (f32)
        + 4 * E * (6 * L + 4 * S)            # live activation slabs (q, qn, qp, attn, kp, vp, ...)
        + 4 * (4 * E) * L                    # MLP hidden (L, 4E) in f32
        + ctx_itemsize * E * L               # attention-context scratch
    )
    budget = act_budget - weight_bytes
    nb_max = max(1, budget // per_batch) if budget > 0 else 1
    if N >= min_grid:
        nb_max = min(nb_max, N // min_grid)
    nb_max = max(1, min(int(nb_max), N))
    for nb in range(nb_max, 0, -1):
        if N % nb == 0:
            return nb
    return 1


# ---------------------------------------------------------------------------
# Wrapper (weight prep, batch blocking, pallas_call setup)
# ---------------------------------------------------------------------------
def text_fusion_transformer_ver2(query, key, value, params, *, heads, layers=2,
                                 use_bf16_matmul=False, batch_block=None):
    """query: (L, N, E); key/value: (S, N, E) — PyTorch MHA (seq, batch, embed) layout."""
    L, N, E = query.shape
    S = key.shape[0]
    assert key.shape == (S, N, E) and value.shape == (S, N, E)
    assert E % heads == 0
    hd = E // heads
    scale = 1.0 / math.sqrt(hd)
    f32 = jnp.float32
    mm_dtype = jnp.bfloat16 if use_bf16_matmul else f32

    # One XLA transpose in HBM: (L, N, E) -> (N, L, E) so the kernel blocks the leading
    # (batch) dim and every in-kernel load/store is lane-dense (no sublane staging loops).
    q = jnp.transpose(query.astype(f32), (1, 0, 2))
    k = jnp.transpose(key.astype(f32), (1, 0, 2))
    v = jnp.transpose(value.astype(f32), (1, 0, 2))

    in_w = params["in_proj_weight"].astype(f32)      # (3E, E)
    in_b = params["in_proj_bias"].astype(f32)        # (3E,)
    # pre-transpose so the kernel computes x @ W; fold 1/sqrt(hd) into Wq / bq.
    # Matmul weights go to mm_dtype (bf16 fast path: half HBM traffic + VMEM); biases/LN stay f32.
    wq = (jnp.transpose(in_w[:E]) * scale).astype(mm_dtype)       # (E, E)
    wk = jnp.transpose(in_w[E:2 * E]).astype(mm_dtype)
    wv = jnp.transpose(in_w[2 * E:]).astype(mm_dtype)
    bq = (in_b[:E] * scale).reshape(1, E)
    bk = in_b[E:2 * E].reshape(1, E)
    bv = in_b[2 * E:].reshape(1, E)
    wo = jnp.transpose(params["out_proj_weight"].astype(f32)).astype(mm_dtype)   # (E, E)
    bo = params["out_proj_bias"].astype(f32).reshape(1, E)
    g1 = params["ln1_weight"].astype(f32).reshape(1, E)
    bt1 = params["ln1_bias"].astype(f32).reshape(1, E)
    g2 = params["ln2_weight"].astype(f32).reshape(1, E)
    bt2 = params["ln2_bias"].astype(f32).reshape(1, E)
    w1 = jnp.transpose(params["mlp_w1"].astype(f32)).astype(mm_dtype)            # (E, 4E)
    bm1 = params["mlp_b1"].astype(f32).reshape(1, 4 * E)
    w2 = jnp.transpose(params["mlp_w2"].astype(f32)).astype(mm_dtype)            # (4E, E)
    bm2 = params["mlp_b2"].astype(f32).reshape(1, E)

    weights = (g1, bt1, g2, bt2, wq, wk, wv, bq, bk, bv, wo, bo, w1, bm1, w2, bm2)
    weight_bytes = sum(int(a.size) * np.dtype(a.dtype).itemsize for a in weights)

    cap = _vmem_capacity_bytes()
    ctx_itemsize = 2 if use_bf16_matmul else 4
    if batch_block is None:
        Nb = _auto_batch_block(N, L, S, E, ctx_itemsize, weight_bytes,
                               act_budget=int(cap * 0.70))
    else:
        Nb = batch_block
    assert N % Nb == 0, "batch block must divide N"
    grid = (N // Nb,)
    M = Nb * L

    kernel = functools.partial(_fusion_kernel, heads, layers, bool(use_bf16_matmul))

    def _const_spec(arr):
        nd = arr.ndim
        idx = lambda b, _n=nd: (0,) * _n
        try:
            # grid-invariant weights: single-buffer (halves resident weight VMEM)
            return pl.BlockSpec(arr.shape, idx, pipeline_mode=pl.Buffered(1))
        except (TypeError, AttributeError):
            return pl.BlockSpec(arr.shape, idx)

    in_specs = [
        pl.BlockSpec((Nb, L, E), lambda b: (b, 0, 0)),
        pl.BlockSpec((Nb, S, E), lambda b: (b, 0, 0)),
        pl.BlockSpec((Nb, S, E), lambda b: (b, 0, 0)),
    ] + [_const_spec(a) for a in weights]

    ctx_dtype = jnp.bfloat16 if use_bf16_matmul else f32

    out = pl.pallas_call(
        kernel,
        out_shape=jax.ShapeDtypeStruct((N, L, E), f32),
        grid_spec=pltpu.PrefetchScalarGridSpec(
            num_scalar_prefetch=0,
            grid=grid,
            in_specs=in_specs,
            out_specs=pl.BlockSpec((Nb, L, E), lambda b: (b, 0, 0)),
            scratch_shapes=[
                pltpu.VMEM((M, E), ctx_dtype),    # attention context (all heads, one out_proj GEMM)
            ],
        ),
        compiler_params=pltpu.CompilerParams(
            dimension_semantics=("parallel",),
            vmem_limit_bytes=int(cap * 0.85),
        ),
    )(q, k, v, *weights)

    # back to the PyTorch (L, N, E) layout with one XLA transpose
    return jnp.transpose(out, (1, 0, 2))


# ---------------------------------------------------------------------------
# Pure-JAX reference (mirrors the PyTorch forward, exact erf GELU)
# ---------------------------------------------------------------------------
def reference(query, key, value, params, *, heads, layers=2):
    E = query.shape[-1]
    hd = E // heads
    in_w, in_b = params["in_proj_weight"], params["in_proj_bias"]

    def ln(x, g, b, eps=1e-5):
        mu = jnp.mean(x, -1, keepdims=True)
        var = jnp.mean((x - mu) ** 2, -1, keepdims=True)
        return (x - mu) * jax.lax.rsqrt(var + eps) * g + b

    q, k, v = query, key, value
    for _ in range(layers):
        q = ln(q, params["ln1_weight"], params["ln1_bias"])
        k = ln(k, params["ln1_weight"], params["ln1_bias"])
        v = ln(v, params["ln1_weight"], params["ln1_bias"])
        L, N, _ = q.shape
        S = k.shape[0]
        qp = q @ in_w[:E].T + in_b[:E]
        kp = k @ in_w[E:2 * E].T + in_b[E:2 * E]
        vp = v @ in_w[2 * E:].T + in_b[2 * E:]
        qh = qp.reshape(L, N, heads, hd).transpose(1, 2, 0, 3)
        kh = kp.reshape(S, N, heads, hd).transpose(1, 2, 0, 3)
        vh = vp.reshape(S, N, heads, hd).transpose(1, 2, 0, 3)
        s = jnp.einsum("nhld,nhsd->nhls", qh, kh) / math.sqrt(hd)
        p = jax.nn.softmax(s, axis=-1)
        o = jnp.einsum("nhls,nhsd->nhld", p, vh)
        o = o.transpose(2, 0, 1, 3).reshape(L, N, E)
        attn = o @ params["out_proj_weight"].T + params["out_proj_bias"]
        q = q + attn
        qn2 = ln(q, params["ln2_weight"], params["ln2_bias"])
        h = qn2 @ params["mlp_w1"].T + params["mlp_b1"]
        h = 0.5 * h * (1.0 + jax.lax.erf(h / math.sqrt(2.0)))   # exact GELU
        q = q + h @ params["mlp_w2"].T + params["mlp_b2"]
    return q


# ---------------------------------------------------------------------------
if __name__ == "__main__":
    L, S, N, E, H, LAYERS = 8, 8, 2, 32, 4, 2

    key0 = jax.random.PRNGKey(0)
    keys = jax.random.split(key0, 16)

    query = jax.random.normal(keys[0], (L, N, E), jnp.float32)
    key_t = jax.random.normal(keys[1], (S, N, E), jnp.float32)
    value = jax.random.normal(keys[2], (S, N, E), jnp.float32)

    params = dict(
        in_proj_weight=jax.random.normal(keys[3], (3 * E, E)) * (1.0 / math.sqrt(E)),
        in_proj_bias=0.02 * jax.random.normal(keys[4], (3 * E,)),
        out_proj_weight=jax.random.normal(keys[5], (E, E)) * (1.0 / math.sqrt(E)),
        out_proj_bias=0.02 * jax.random.normal(keys[6], (E,)),
        ln1_weight=1.0 + 0.1 * jax.random.normal(keys[7], (E,)),
        ln1_bias=0.1 * jax.random.normal(keys[8], (E,)),
        ln2_weight=1.0 + 0.1 * jax.random.normal(keys[9], (E,)),
        ln2_bias=0.1 * jax.random.normal(keys[10], (E,)),
        mlp_w1=jax.random.normal(keys[11], (4 * E, E)) * (1.0 / math.sqrt(E)),
        mlp_b1=0.02 * jax.random.normal(keys[12], (4 * E,)),
        mlp_w2=jax.random.normal(keys[13], (E, 4 * E)) * (1.0 / math.sqrt(4 * E)),
        mlp_b2=0.02 * jax.random.normal(keys[14], (E,)),
    )
    params = {k: v.astype(jnp.float32) for k, v in params.items()}

    ref = reference(query, key_t, value, params, heads=H, layers=LAYERS)

    # exact-precision (f32 matmul) path
    out = text_fusion_transformer_ver2(query, key_t, value, params,
                                       heads=H, layers=LAYERS)
    out = jax.block_until_ready(out)
    np.testing.assert_allclose(np.asarray(out), np.asarray(ref),
                               rtol=2e-4, atol=2e-4)

    # bf16-MXU fast path (valid on v5e/v6e/v7x); looser tolerance for bf16 rounding
    out_bf16 = text_fusion_transformer_ver2(query, key_t, value, params,
                                            heads=H, layers=LAYERS,
                                            use_bf16_matmul=True)
    out_bf16 = jax.block_until_ready(out_bf16)
    np.testing.assert_allclose(np.asarray(out_bf16), np.asarray(ref),
                               rtol=5e-2, atol=1e-1)

    print("KERNEL_OK")
</pallas_src>

<mosaic_0001>
module attributes {stable_mosaic.version = 11 : i64} {
  func.func @_fusion_kernel(%arg0: i32, %arg1: memref<1x8x32xf32, #tpu.memory_space<vmem>>, %arg2: memref<1x8x32xf32, #tpu.memory_space<vmem>>, %arg3: memref<1x8x32xf32, #tpu.memory_space<vmem>>, %arg4: memref<1x32xf32, #tpu.memory_space<vmem>>, %arg5: memref<1x32xf32, #tpu.memory_space<vmem>>, %arg6: memref<1x32xf32, #tpu.memory_space<vmem>>, %arg7: memref<1x32xf32, #tpu.memory_space<vmem>>, %arg8: memref<32x32xf32, #tpu.memory_space<vmem>>, %arg9: memref<32x32xf32, #tpu.memory_space<vmem>>, %arg10: memref<32x32xf32, #tpu.memory_space<vmem>>, %arg11: memref<1x32xf32, #tpu.memory_space<vmem>>, %arg12: memref<1x32xf32, #tpu.memory_space<vmem>>, %arg13: memref<1x32xf32, #tpu.memory_space<vmem>>, %arg14: memref<32x32xf32, #tpu.memory_space<vmem>>, %arg15: memref<1x32xf32, #tpu.memory_space<vmem>>, %arg16: memref<32x128xf32, #tpu.memory_space<vmem>>, %arg17: memref<1x128xf32, #tpu.memory_space<vmem>>, %arg18: memref<128x32xf32, #tpu.memory_space<vmem>>, %arg19: memref<1x32xf32, #tpu.memory_space<vmem>>, %arg20: memref<1x8x32xf32, #tpu.memory_space<vmem>>, %arg21: memref<8x32xf32, #tpu.memory_space<vmem>>) attributes {dimension_semantics = [#tpu.dimension_semantics<parallel>], iteration_bounds = array<i64: 2>, scalar_prefetch = 0 : i64, scratch_operands = 1 : i64, tpu.core_type = #tpu.core_type<tc>, window_params = [{transform_indices = @transform_0, window_bounds = array<i64: 1, 8, 32>}, {transform_indices = @transform_1, window_bounds = array<i64: 1, 8, 32>}, {transform_indices = @transform_2, window_bounds = array<i64: 1, 8, 32>}, {pipeline_mode = #tpu.pipeline_mode<synchronous>, transform_indices = @transform_3, window_bounds = array<i64: 1, 32>}, {pipeline_mode = #tpu.pipeline_mode<synchronous>, transform_indices = @transform_4, window_bounds = array<i64: 1, 32>}, {pipeline_mode = #tpu.pipeline_mode<synchronous>, transform_indices = @transform_5, window_bounds = array<i64: 1, 32>}, {pipeline_mode = #tpu.pipeline_mode<synchronous>, transform_indices = @transform_6, window_bounds = array<i64: 1, 32>}, {pipeline_mode = #tpu.pipeline_mode<synchronous>, transform_indices = @transform_7, window_bounds = array<i64: 32, 32>}, {pipeline_mode = #tpu.pipeline_mode<synchronous>, transform_indices = @transform_8, window_bounds = array<i64: 32, 32>}, {pipeline_mode = #tpu.pipeline_mode<synchronous>, transform_indices = @transform_9, window_bounds = array<i64: 32, 32>}, {pipeline_mode = #tpu.pipeline_mode<synchronous>, transform_indices = @transform_10, window_bounds = array<i64: 1, 32>}, {pipeline_mode = #tpu.pipeline_mode<synchronous>, transform_indices = @transform_11, window_bounds = array<i64: 1, 32>}, {pipeline_mode = #tpu.pipeline_mode<synchronous>, transform_indices = @transform_12, window_bounds = array<i64: 1, 32>}, {pipeline_mode = #tpu.pipeline_mode<synchronous>, transform_indices = @transform_13, window_bounds = array<i64: 32, 32>}, {pipeline_mode = #tpu.pipeline_mode<synchronous>, transform_indices = @transform_14, window_bounds = array<i64: 1, 32>}, {pipeline_mode = #tpu.pipeline_mode<synchronous>, transform_indices = @transform_15, window_bounds = array<i64: 32, 128>}, {pipeline_mode = #tpu.pipeline_mode<synchronous>, transform_indices = @transform_16, window_bounds = array<i64: 1, 128>}, {pipeline_mode = #tpu.pipeline_mode<synchronous>, transform_indices = @transform_17, window_bounds = array<i64: 128, 32>}, {pipeline_mode = #tpu.pipeline_mode<synchronous>, transform_indices = @transform_18, window_bounds = array<i64: 1, 32>}, {transform_indices = @transform_19, window_bounds = array<i64: 1, 8, 32>}]} {
    %c0 = arith.constant 0 : index
    %c0_0 = arith.constant 0 : index
    %0 = vector.load %arg4[%c0, %c0_0] : memref<1x32xf32, #tpu.memory_space<vmem>>, vector<1x32xf32>
    %c0_1 = arith.constant 0 : index
    %c0_2 = arith.constant 0 : index
    %1 = vector.load %arg5[%c0_1, %c0_2] : memref<1x32xf32, #tpu.memory_space<vmem>>, vector<1x32xf32>
    %c0_3 = arith.constant 0 : index
    %c0_4 = arith.constant 0 : index
    %2 = vector.load %arg6[%c0_3, %c0_4] : memref<1x32xf32, #tpu.memory_space<vmem>>, vector<1x32xf32>
    %c0_5 = arith.constant 0 : index
    %c0_6 = arith.constant 0 : index
    %3 = vector.load %arg7[%c0_5, %c0_6] : memref<1x32xf32, #tpu.memory_space<vmem>>, vector<1x32xf32>
    %c0_7 = arith.constant 0 : index
    %c0_8 = arith.constant 0 : index
    %4 = vector.load %arg11[%c0_7, %c0_8] : memref<1x32xf32, #tpu.memory_space<vmem>>, vector<1x32xf32>
    %c0_9 = arith.constant 0 : index
    %c0_10 = arith.constant 0 : index
    %5 = vector.load %arg12[%c0_9, %c0_10] : memref<1x32xf32, #tpu.memory_space<vmem>>, vector<1x32xf32>
    %c0_11 = arith.constant 0 : index
    %c0_12 = arith.constant 0 : index
    %6 = vector.load %arg13[%c0_11, %c0_12] : memref<1x32xf32, #tpu.memory_space<vmem>>, vector<1x32xf32>
    %c0_13 = arith.constant 0 : index
    %c0_14 = arith.constant 0 : index
    %7 = vector.load %arg15[%c0_13, %c0_14] : memref<1x32xf32, #tpu.memory_space<vmem>>, vector<1x32xf32>
    %c0_15 = arith.constant 0 : index
    %c0_16 = arith.constant 0 : index
    %8 = vector.load %arg17[%c0_15, %c0_16] : memref<1x128xf32, #tpu.memory_space<vmem>>, vector<1x128xf32>
    %c0_17 = arith.constant 0 : index
    %c0_18 = arith.constant 0 : index
    %9 = vector.load %arg19[%c0_17, %c0_18] : memref<1x32xf32, #tpu.memory_space<vmem>>, vector<1x32xf32>
    %c0_19 = arith.constant 0 : index
    %c0_20 = arith.constant 0 : index
    %10 = vector.load %arg8[%c0_19, %c0_20] : memref<32x32xf32, #tpu.memory_space<vmem>>, vector<32x32xf32>
    %c0_21 = arith.constant 0 : index
    %c0_22 = arith.constant 0 : index
    %11 = vector.load %arg9[%c0_21, %c0_22] : memref<32x32xf32, #tpu.memory_space<vmem>>, vector<32x32xf32>
    %c0_23 = arith.constant 0 : index
    %c0_24 = arith.constant 0 : index
    %12 = vector.load %arg10[%c0_23, %c0_24] : memref<32x32xf32, #tpu.memory_space<vmem>>, vector<32x32xf32>
    %c0_25 = arith.constant 0 : index
    %c0_26 = arith.constant 0 : index
    %13 = vector.load %arg14[%c0_25, %c0_26] : memref<32x32xf32, #tpu.memory_space<vmem>>, vector<32x32xf32>
    %c0_27 = arith.constant 0 : index
    %c0_28 = arith.constant 0 : index
    %14 = vector.load %arg16[%c0_27, %c0_28] : memref<32x128xf32, #tpu.memory_space<vmem>>, vector<32x128xf32>
    %c0_29 = arith.constant 0 : index
    %c0_30 = arith.constant 0 : index
    %15 = vector.load %arg18[%c0_29, %c0_30] : memref<128x32xf32, #tpu.memory_space<vmem>>, vector<128x32xf32>
    %c0_31 = arith.constant 0 : index
    %c0_32 = arith.constant 0 : index
    %c0_33 = arith.constant 0 : index
    %16 = vector.load %arg1[%c0_31, %c0_32, %c0_33] : memref<1x8x32xf32, #tpu.memory_space<vmem>>, vector<1x8x32xf32>
    %17 = vector.shape_cast %16 : vector<1x8x32xf32> to vector<8x32xf32>
    %c0_34 = arith.constant 0 : index
    %c0_35 = arith.constant 0 : index
    %c0_36 = arith.constant 0 : index
    %18 = vector.load %arg2[%c0_34, %c0_35, %c0_36] : memref<1x8x32xf32, #tpu.memory_space<vmem>>, vector<1x8x32xf32>
    %19 = vector.shape_cast %18 : vector<1x8x32xf32> to vector<8x32xf32>
    %c0_37 = arith.constant 0 : index
    %c0_38 = arith.constant 0 : index
    %c0_39 = arith.constant 0 : index
    %20 = vector.load %arg3[%c0_37, %c0_38, %c0_39] : memref<1x8x32xf32, #tpu.memory_space<vmem>>, vector<1x8x32xf32>
    %21 = vector.shape_cast %20 : vector<1x8x32xf32> to vector<8x32xf32>
    %cst = arith.constant dense<0.000000e+00> : vector<8xf32>
    %22 = vector.multi_reduction <add>, %17, %cst [1] : vector<8x32xf32> to vector<8xf32>
    %23 = vector.shape_cast %22 : vector<8xf32> to vector<8x1xf32>
    %cst_40 = arith.constant 3.200000e+01 : f32
    %24 = vector.broadcast %cst_40 : f32 to vector<8x1xf32>
    %25 = arith.divf %23, %24 : vector<8x1xf32>
    %26 = vector.broadcast %25 : vector<8x1xf32> to vector<8x32xf32>
    %27 = arith.subf %17, %26 : vector<8x32xf32>
    %28 = arith.mulf %27, %27 : vector<8x32xf32>
    %cst_41 = arith.constant dense<0.000000e+00> : vector<8xf32>
    %29 = vector.multi_reduction <add>, %28, %cst_41 [1] : vector<8x32xf32> to vector<8xf32>
    %30 = vector.shape_cast %29 : vector<8xf32> to vector<8x1xf32>
    %cst_42 = arith.constant 3.200000e+01 : f32
    %31 = vector.broadcast %cst_42 : f32 to vector<8x1xf32>
    %32 = arith.divf %30, %31 : vector<8x1xf32>
    %33 = vector.broadcast %25 : vector<8x1xf32> to vector<8x32xf32>
    %34 = arith.subf %17, %33 : vector<8x32xf32>
    %cst_43 = arith.constant 9.99999974E-6 : f32
    %35 = vector.broadcast %cst_43 : f32 to vector<8x1xf32>
    %36 = arith.addf %32, %35 : vector<8x1xf32>
    %37 = math.rsqrt %36 : vector<8x1xf32>
    %38 = vector.broadcast %37 : vector<8x1xf32> to vector<8x32xf32>
    %39 = arith.mulf %34, %38 : vector<8x32xf32>
    %40 = vector.broadcast %0 : vector<1x32xf32> to vector<8x32xf32>
    %41 = arith.mulf %39, %40 : vector<8x32xf32>
    %42 = vector.broadcast %1 : vector<1x32xf32> to vector<8x32xf32>
    %43 = arith.addf %41, %42 : vector<8x32xf32>
    %cst_44 = arith.constant dense<0.000000e+00> : vector<8xf32>
    %44 = vector.multi_reduction <add>, %19, %cst_44 [1] : vector<8x32xf32> to vector<8xf32>
    %45 = vector.shape_cast %44 : vector<8xf32> to vector<8x1xf32>
    %cst_45 = arith.constant 3.200000e+01 : f32
    %46 = vector.broadcast %cst_45 : f32 to vector<8x1xf32>
    %47 = arith.divf %45, %46 : vector<8x1xf32>
    %48 = vector.broadcast %47 : vector<8x1xf32> to vector<8x32xf32>
    %49 = arith.subf %19, %48 : vector<8x32xf32>
    %50 = arith.mulf %49, %49 : vector<8x32xf32>
    %cst_46 = arith.constant dense<0.000000e+00> : vector<8xf32>
    %51 = vector.multi_reduction <add>, %50, %cst_46 [1] : vector<8x32xf32> to vector<8xf32>
    %52 = vector.shape_cast %51 : vector<8xf32> to vector<8x1xf32>
    %cst_47 = arith.constant 3.200000e+01 : f32
    %53 = vector.broadcast %cst_47 : f32 to vector<8x1xf32>
    %54 = arith.divf %52, %53 : vector<8x1xf32>
    %55 = vector.broadcast %47 : vector<8x1xf32> to vector<8x32xf32>
    %56 = arith.subf %19, %55 : vector<8x32xf32>
    %cst_48 = arith.constant 9.99999974E-6 : f32
    %57 = vector.broadcast %cst_48 : f32 to vector<8x1xf32>
    %58 = arith.addf %54, %57 : vector<8x1xf32>
    %59 = math.rsqrt %58 : vector<8x1xf32>
    %60 = vector.broadcast %59 : vector<8x1xf32> to vector<8x32xf32>
    %61 = arith.mulf %56, %60 : vector<8x32xf32>
    %62 = vector.broadcast %0 : vector<1x32xf32> to vector<8x32xf32>
    %63 = arith.mulf %61, %62 : vector<8x32xf32>
    %64 = vector.broadcast %1 : vector<1x32xf32> to vector<8x32xf32>
    %65 = arith.addf %63, %64 : vector<8x32xf32>
    %cst_49 = arith.constant dense<0.000000e+00> : vector<8xf32>
    %66 = vector.multi_reduction <add>, %21, %cst_49 [1] : vector<8x32xf32> to vector<8xf32>
    %67 = vector.shape_cast %66 : vector<8xf32> to vector<8x1xf32>
    %cst_50 = arith.constant 3.200000e+01 : f32
    %68 = vector.broadcast %cst_50 : f32 to vector<8x1xf32>
    %69 = arith.divf %67, %68 : vector<8x1xf32>
    %70 = vector.broadcast %69 : vector<8x1xf32> to vector<8x32xf32>
    %71 = arith.subf %21, %70 : vector<8x32xf32>
    %72 = arith.mulf %71, %71 : vector<8x32xf32>
    %cst_51 = arith.constant dense<0.000000e+00> : vector<8xf32>
    %73 = vector.multi_reduction <add>, %72, %cst_51 [1] : vector<8x32xf32> to vector<8xf32>
    %74 = vector.shape_cast %73 : vector<8xf32> to vector<8x1xf32>
    %cst_52 = arith.constant 3.200000e+01 : f32
    %75 = vector.broadcast %cst_52 : f32 to vector<8x1xf32>
    %76 = arith.divf %74, %75 : vector<8x1xf32>
    %77 = vector.broadcast %69 : vector<8x1xf32> to vector<8x32xf32>
    %78 = arith.subf %21, %77 : vector<8x32xf32>
    %cst_53 = arith.constant 9.99999974E-6 : f32
    %79 = vector.broadcast %cst_53 : f32 to vector<8x1xf32>
    %80 = arith.addf %76, %79 : vector<8x1xf32>
    %81 = math.rsqrt %80 : vector<8x1xf32>
    %82 = vector.broadcast %81 : vector<8x1xf32> to vector<8x32xf32>
    %83 = arith.mulf %78, %82 : vector<8x32xf32>
    %84 = vector.broadcast %0 : vector<1x32xf32> to vector<8x32xf32>
    %85 = arith.mulf %83, %84 : vector<8x32xf32>
    %86 = vector.broadcast %1 : vector<1x32xf32> to vector<8x32xf32>
    %87 = arith.addf %85, %86 : vector<8x32xf32>
    %cst_54 = arith.constant dense<0.000000e+00> : vector<8x32xf32>
    %88 = tpu.matmul %43, %10, %cst_54 {dimension_numbers = #tpu.dot_dimension_numbers<[1], [0], [0], [1], [0, 0, 1, 1], [], []>} : vector<8x32xf32>, vector<32x32xf32>, vector<8x32xf32> -> vector<8x32xf32>
    %89 = vector.broadcast %4 : vector<1x32xf32> to vector<8x32xf32>
    %90 = arith.addf %88, %89 : vector<8x32xf32>
    %cst_55 = arith.constant dense<0.000000e+00> : vector<8x32xf32>
    %91 = tpu.matmul %65, %11, %cst_55 {dimension_numbers = #tpu.dot_dimension_numbers<[1], [0], [0], [1], [0, 0, 1, 1], [], []>} : vector<8x32xf32>, vector<32x32xf32>, vector<8x32xf32> -> vector<8x32xf32>
    %92 = vector.broadcast %5 : vector<1x32xf32> to vector<8x32xf32>
    %93 = arith.addf %91, %92 : vector<8x32xf32>
    %cst_56 = arith.constant dense<0.000000e+00> : vector<8x32xf32>
    %94 = tpu.matmul %87, %12, %cst_56 {dimension_numbers = #tpu.dot_dimension_numbers<[1], [0], [0], [1], [0, 0, 1, 1], [], []>} : vector<8x32xf32>, vector<32x32xf32>, vector<8x32xf32> -> vector<8x32xf32>
    %95 = vector.broadcast %6 : vector<1x32xf32> to vector<8x32xf32>
    %96 = arith.addf %94, %95 : vector<8x32xf32>
    %97 = vector.extract_strided_slice %90 {offsets = [0, 0], sizes = [8, 8], strides = [1, 1]} : vector<8x32xf32> to vector<8x8xf32>
    %98 = vector.shape_cast %97 : vector<8x8xf32> to vector<1x8x8xf32>
    %99 = vector.extract_strided_slice %93 {offsets = [0, 0], sizes = [8, 8], strides = [1, 1]} : vector<8x32xf32> to vector<8x8xf32>
    %100 = vector.shape_cast %99 : vector<8x8xf32> to vector<1x8x8xf32>
    %101 = vector.extract_strided_slice %96 {offsets = [0, 0], sizes = [8, 8], strides = [1, 1]} : vector<8x32xf32> to vector<8x8xf32>
    %102 = vector.shape_cast %101 : vector<8x8xf32> to vector<1x8x8xf32>
    %cst_57 = arith.constant dense<0.000000e+00> : vector<1x8x8xf32>
    %103 = tpu.matmul %98, %100, %cst_57 {dimension_numbers = #tpu.dot_dimension_numbers<[2], [2], [1], [1], [0, 0, 0, 1, 1, 1], [0], [0]>} : vector<1x8x8xf32>, vector<1x8x8xf32>, vector<1x8x8xf32> -> vector<1x8x8xf32>
    %cst_58 = arith.constant dense<0xFF800000> : vector<1x8xf32>
    %104 = vector.multi_reduction <maximumf>, %103, %cst_58 [2] : vector<1x8x8xf32> to vector<1x8xf32>
    %105 = vector.shape_cast %104 : vector<1x8xf32> to vector<1x8x1xf32>
    %106 = vector.broadcast %105 : vector<1x8x1xf32> to vector<1x8x8xf32>
    %107 = arith.subf %103, %106 : vector<1x8x8xf32>
    %108 = math.exp %107 : vector<1x8x8xf32>
    %cst_59 = arith.constant dense<0.000000e+00> : vector<1x8xf32>
    %109 = vector.multi_reduction <add>, %108, %cst_59 [2] : vector<1x8x8xf32> to vector<1x8xf32>
    %110 = vector.shape_cast %109 : vector<1x8xf32> to vector<1x8x1xf32>
    %111 = tpu.reciprocal %110 {approx = true} : vector<1x8x1xf32> -> vector<1x8x1xf32>
    %112 = arith.mulf %110, %111 : vector<1x8x1xf32>
    %cst_60 = arith.constant 2.000000e+00 : f32
    %113 = vector.broadcast %cst_60 : f32 to vector<1x8x1xf32>
    %114 = arith.subf %113, %112 : vector<1x8x1xf32>
    %115 = arith.mulf %111, %114 : vector<1x8x1xf32>
    %116 = vector.broadcast %115 : vector<1x8x1xf32> to vector<1x8x8xf32>
    %117 = arith.mulf %108, %116 : vector<1x8x8xf32>
    %cst_61 = arith.constant dense<0.000000e+00> : vector<1x8x8xf32>
    %118 = tpu.matmul %117, %102, %cst_61 {dimension_numbers = #tpu.dot_dimension_numbers<[2], [1], [1], [2], [0, 0, 0, 1, 1, 2], [0], [0]>} : vector<1x8x8xf32>, vector<1x8x8xf32>, vector<1x8x8xf32> -> vector<1x8x8xf32>
    %119 = vector.shape_cast %118 : vector<1x8x8xf32> to vector<8x8xf32>
    %c0_62 = arith.constant 0 : index
    %c0_63 = arith.constant 0 : index
    %120 = vector.load %arg21[%c0_62, %c0_63] : memref<8x32xf32, #tpu.memory_space<vmem>>, vector<8x8xf32>
    tpu.vector_store %arg21[%c0_62, %c0_63], %119 {strides = array<i32>} : memref<8x32xf32, #tpu.memory_space<vmem>>, vector<8x8xf32>,
    %121 = vector.extract_strided_slice %90 {offsets = [0, 8], sizes = [8, 8], strides = [1, 1]} : vector<8x32xf32> to vector<8x8xf32>
    %122 = vector.shape_cast %121 : vector<8x8xf32> to vector<1x8x8xf32>
    %123 = vector.extract_strided_slice %93 {offsets = [0, 8], sizes = [8, 8], strides = [1, 1]} : vector<8x32xf32> to vector<8x8xf32>
    %124 = vector.shape_cast %123 : vector<8x8xf32> to vector<1x8x8xf32>
    %125 = vector.extract_strided_slice %96 {offsets = [0, 8], sizes = [8, 8], strides = [1, 1]} : vector<8x32xf32> to vector<8x8xf32>
    %126 = vector.shape_cast %125 : vector<8x8xf32> to vector<1x8x8xf32>
    %cst_64 = arith.constant dense<0.000000e+00> : vector<1x8x8xf32>
    %127 = tpu.matmul %122, %124, %cst_64 {dimension_numbers = #tpu.dot_dimension_numbers<[2], [2], [1], [1], [0, 0, 0, 1, 1, 1], [0], [0]>} : vector<1x8x8xf32>, vector<1x8x8xf32>, vector<1x8x8xf32> -> vector<1x8x8xf32>
    %cst_65 = arith.constant dense<0xFF800000> : vector<1x8xf32>
    %128 = vector.multi_reduction <maximumf>, %127, %cst_65 [2] : vector<1x8x8xf32> to vector<1x8xf32>
    %129 = vector.shape_cast %128 : vector<1x8xf32> to vector<1x8x1xf32>
    %130 = vector.broadcast %129 : vector<1x8x1xf32> to vector<1x8x8xf32>
    %131 = arith.subf %127, %130 : vector<1x8x8xf32>
    %132 = math.exp %131 : vector<1x8x8xf32>
    %cst_66 = arith.constant dense<0.000000e+00> : vector<1x8xf32>
    %133 = vector.multi_reduction <add>, %132, %cst_66 [2] : vector<1x8x8xf32> to vector<1x8xf32>
    %134 = vector.shape_cast %133 : vector<1x8xf32> to vector<1x8x1xf32>
    %135 = tpu.reciprocal %134 {approx = true} : vector<1x8x1xf32> -> vector<1x8x1xf32>
    %136 = arith.mulf %134, %135 : vector<1x8x1xf32>
    %cst_67 = arith.constant 2.000000e+00 : f32
    %137 = vector.broadcast %cst_67 : f32 to vector<1x8x1xf32>
    %138 = arith.subf %137, %136 : vector<1x8x1xf32>
    %139 = arith.mulf %135, %138 : vector<1x8x1xf32>
    %140 = vector.broadcast %139 : vector<1x8x1xf32> to vector<1x8x8xf32>
    %141 = arith.mulf %132, %140 : vector<1x8x8xf32>
    %cst_68 = arith.constant dense<0.000000e+00> : vector<1x8x8xf32>
    %142 = tpu.matmul %141, %126, %cst_68 {dimension_numbers = #tpu.dot_dimension_numbers<[2], [1], [1], [2], [0, 0, 0, 1, 1, 2], [0], [0]>} : vector<1x8x8xf32>, vector<1x8x8xf32>, vector<1x8x8xf32> -> vector<1x8x8xf32>
    %143 = vector.shape_cast %142 : vector<1x8x8xf32> to vector<8x8xf32>
    %c0_69 = arith.constant 0 : index
    %c8 = arith.constant 8 : index
    %144 = vector.load %arg21[%c0_69, %c8] : memref<8x32xf32, #tpu.memory_space<vmem>>, vector<8x8xf32>
    tpu.vector_store %arg21[%c0_69, %c8], %143 {strides = array<i32>} : memref<8x32xf32, #tpu.memory_space<vmem>>, vector<8x8xf32>,
    %145 = vector.extract_strided_slice %90 {offsets = [0, 16], sizes = [8, 8], strides = [1, 1]} : vector<8x32xf32> to vector<8x8xf32>
    %146 = vector.shape_cast %145 : vector<8x8xf32> to vector<1x8x8xf32>
    %147 = vector.extract_strided_slice %93 {offsets = [0, 16], sizes = [8, 8], strides = [1, 1]} : vector<8x32xf32> to vector<8x8xf32>
    %148 = vector.shape_cast %147 : vector<8x8xf32> to vector<1x8x8xf32>
    %149 = vector.extract_strided_slice %96 {offsets = [0, 16], sizes = [8, 8], strides = [1, 1]} : vector<8x32xf32> to vector<8x8xf32>
    %150 = vector.shape_cast %149 : vector<8x8xf32> to vector<1x8x8xf32>
    %cst_70 = arith.constant dense<0.000000e+00> : vector<1x8x8xf32>
    %151 = tpu.matmul %146, %148, %cst_70 {dimension_numbers = #tpu.dot_dimension_numbers<[2], [2], [1], [1], [0, 0, 0, 1, 1, 1], [0], [0]>} : vector<1x8x8xf32>, vector<1x8x8xf32>, vector<1x8x8xf32> -> vector<1x8x8xf32>
    %cst_71 = arith.constant dense<0xFF800000> : vector<1x8xf32>
    %152 = vector.multi_reduction <maximumf>, %151, %cst_71 [2] : vector<1x8x8xf32> to vector<1x8xf32>
    %153 = vector.shape_cast %152 : vector<1x8xf32> to vector<1x8x1xf32>
    %154 = vector.broadcast %153 : vector<1x8x1xf32> to vector<1x8x8xf32>
    %155 = arith.subf %151, %154 : vector<1x8x8xf32>
    %156 = math.exp %155 : vector<1x8x8xf32>
    %cst_72 = arith.constant dense<0.000000e+00> : vector<1x8xf32>
    %157 = vector.multi_reduction <add>, %156, %cst_72 [2] : vector<1x8x8xf32> to vector<1x8xf32>
    %158 = vector.shape_cast %157 : vector<1x8xf32> to vector<1x8x1xf32>
    %159 = tpu.reciprocal %158 {approx = true} : vector<1x8x1xf32> -> vector<1x8x1xf32>
    %160 = arith.mulf %158, %159 : vector<1x8x1xf32>
    %cst_73 = arith.constant 2.000000e+00 : f32
    %161 = vector.broadcast %cst_73 : f32 to vector<1x8x1xf32>
    %162 = arith.subf %161, %160 : vector<1x8x1xf32>
    %163 = arith.mulf %159, %162 : vector<1x8x1xf32>
    %164 = vector.broadcast %163 : vector<1x8x1xf32> to vector<1x8x8xf32>
    %165 = arith.mulf %156, %164 : vector<1x8x8xf32>
    %cst_74 = arith.constant dense<0.000000e+00> : vector<1x8x8xf32>
    %166 = tpu.matmul %165, %150, %cst_74 {dimension_numbers = #tpu.dot_dimension_numbers<[2], [1], [1], [2], [0, 0, 0, 1, 1, 2], [0], [0]>} : vector<1x8x8xf32>, vector<1x8x8xf32>, vector<1x8x8xf32> -> vector<1x8x8xf32>
    %167 = vector.shape_cast %166 : vector<1x8x8xf32> to vector<8x8xf32>
    %c0_75 = arith.constant 0 : index
    %c16 = arith.constant 16 : index
    %168 = vector.load %arg21[%c0_75, %c16] : memref<8x32xf32, #tpu.memory_space<vmem>>, vector<8x8xf32>
    tpu.vector_store %arg21[%c0_75, %c16], %167 {strides = array<i32>} : memref<8x32xf32, #tpu.memory_space<vmem>>, vector<8x8xf32>,
    %169 = vector.extract_strided_slice %90 {offsets = [0, 24], sizes = [8, 8], strides = [1, 1]} : vector<8x32xf32> to vector<8x8xf32>
    %170 = vector.shape_cast %169 : vector<8x8xf32> to vector<1x8x8xf32>
    %171 = vector.extract_strided_slice %93 {offsets = [0, 24], sizes = [8, 8], strides = [1, 1]} : vector<8x32xf32> to vector<8x8xf32>
    %172 = vector.shape_cast %171 : vector<8x8xf32> to vector<1x8x8xf32>
    %173 = vector.extract_strided_slice %96 {offsets = [0, 24], sizes = [8, 8], strides = [1, 1]} : vector<8x32xf32> to vector<8x8xf32>
    %174 = vector.shape_cast %173 : vector<8x8xf32> to vector<1x8x8xf32>
    %cst_76 = arith.constant dense<0.000000e+00> : vector<1x8x8xf32>
    %175 = tpu.matmul %170, %172, %cst_76 {dimension_numbers = #tpu.dot_dimension_numbers<[2], [2], [1], [1], [0, 0, 0, 1, 1, 1], [0], [0]>} : vector<1x8x8xf32>, vector<1x8x8xf32>, vector<1x8x8xf32> -> vector<1x8x8xf32>
    %cst_77 = arith.constant dense<0xFF800000> : vector<1x8xf32>
    %176 = vector.multi_reduction <maximumf>, %175, %cst_77 [2] : vector<1x8x8xf32> to vector<1x8xf32>
    %177 = vector.shape_cast %176 : vector<1x8xf32> to vector<1x8x1xf32>
    %178 = vector.broadcast %177 : vector<1x8x1xf32> to vector<1x8x8xf32>
    %179 = arith.subf %175, %178 : vector<1x8x8xf32>
    %180 = math.exp %179 : vector<1x8x8xf32>
    %cst_78 = arith.constant dense<0.000000e+00> : vector<1x8xf32>
    %181 = vector.multi_reduction <add>, %180, %cst_78 [2] : vector<1x8x8xf32> to vector<1x8xf32>
    %182 = vector.shape_cast %181 : vector<1x8xf32> to vector<1x8x1xf32>
    %183 = tpu.reciprocal %182 {approx = true} : vector<1x8x1xf32> -> vector<1x8x1xf32>
    %184 = arith.mulf %182, %183 : vector<1x8x1xf32>
    %cst_79 = arith.constant 2.000000e+00 : f32
    %185 = vector.broadcast %cst_79 : f32 to vector<1x8x1xf32>
    %186 = arith.subf %185, %184 : vector<1x8x1xf32>
    %187 = arith.mulf %183, %186 : vector<1x8x1xf32>
    %188 = vector.broadcast %187 : vector<1x8x1xf32> to vector<1x8x8xf32>
    %189 = arith.mulf %180, %188 : vector<1x8x8xf32>
    %cst_80 = arith.constant dense<0.000000e+00> : vector<1x8x8xf32>
    %190 = tpu.matmul %189, %174, %cst_80 {dimension_numbers = #tpu.dot_dimension_numbers<[2], [1], [1], [2], [0, 0, 0, 1, 1, 2], [0], [0]>} : vector<1x8x8xf32>, vector<1x8x8xf32>, vector<1x8x8xf32> -> vector<1x8x8xf32>
    %191 = vector.shape_cast %190 : vector<1x8x8xf32> to vector<8x8xf32>
    %c0_81 = arith.constant 0 : index
    %c24 = arith.constant 24 : index
    %192 = vector.load %arg21[%c0_81, %c24] : memref<8x32xf32, #tpu.memory_space<vmem>>, vector<8x8xf32>
    tpu.vector_store %arg21[%c0_81, %c24], %191 {strides = array<i32>} : memref<8x32xf32, #tpu.memory_space<vmem>>, vector<8x8xf32>,
    %c0_82 = arith.constant 0 : index
    %c0_83 = arith.constant 0 : index
    %193 = vector.load %arg21[%c0_82, %c0_83] : memref<8x32xf32, #tpu.memory_space<vmem>>, vector<8x32xf32>
    %cst_84 = arith.constant dense<0.000000e+00> : vector<8x32xf32>
    %194 = tpu.matmul %193, %13, %cst_84 {dimension_numbers = #tpu.dot_dimension_numbers<[1], [0], [0], [1], [0, 0, 1, 1], [], []>} : vector<8x32xf32>, vector<32x32xf32>, vector<8x32xf32> -> vector<8x32xf32>
    %195 = vector.broadcast %7 : vector<1x32xf32> to vector<8x32xf32>
    %196 = arith.addf %194, %195 : vector<8x32xf32>
    %197 = arith.addf %43, %196 : vector<8x32xf32>
    %cst_85 = arith.constant dense<0.000000e+00> : vector<8xf32>
    %198 = vector.multi_reduction <add>, %197, %cst_85 [1] : vector<8x32xf32> to vector<8xf32>
    %199 = vector.shape_cast %198 : vector<8xf32> to vector<8x1xf32>
    %cst_86 = arith.constant 3.200000e+01 : f32
    %200 = vector.broadcast %cst_86 : f32 to vector<8x1xf32>
    %201 = arith.divf %199, %200 : vector<8x1xf32>
    %202 = vector.broadcast %201 : vector<8x1xf32> to vector<8x32xf32>
    %203 = arith.subf %197, %202 : vector<8x32xf32>
    %204 = arith.mulf %203, %203 : vector<8x32xf32>
    %cst_87 = arith.constant dense<0.000000e+00> : vector<8xf32>
    %205 = vector.multi_reduction <add>, %204, %cst_87 [1] : vector<8x32xf32> to vector<8xf32>
    %206 = vector.shape_cast %205 : vector<8xf32> to vector<8x1xf32>
    %cst_88 = arith.constant 3.200000e+01 : f32
    %207 = vector.broadcast %cst_88 : f32 to vector<8x1xf32>
    %208 = arith.divf %206, %207 : vector<8x1xf32>
    %209 = vector.broadcast %201 : vector<8x1xf32> to vector<8x32xf32>
    %210 = arith.subf %197, %209 : vector<8x32xf32>
    %cst_89 = arith.constant 9.99999974E-6 : f32
    %211 = vector.broadcast %cst_89 : f32 to vector<8x1xf32>
    %212 = arith.addf %208, %211 : vector<8x1xf32>
    %213 = math.rsqrt %212 : vector<8x1xf32>
    %214 = vector.broadcast %213 : vector<8x1xf32> to vector<8x32xf32>
    %215 = arith.mulf %210, %214 : vector<8x32xf32>
    %216 = vector.broadcast %2 : vector<1x32xf32> to vector<8x32xf32>
    %217 = arith.mulf %215, %216 : vector<8x32xf32>
    %218 = vector.broadcast %3 : vector<1x32xf32> to vector<8x32xf32>
    %219 = arith.addf %217, %218 : vector<8x32xf32>
    %cst_90 = arith.constant dense<0.000000e+00> : vector<8x128xf32>
    %220 = tpu.matmul %219, %14, %cst_90 {dimension_numbers = #tpu.dot_dimension_numbers<[1], [0], [0], [1], [0, 0, 1, 1], [], []>} : vector<8x32xf32>, vector<32x128xf32>, vector<8x128xf32> -> vector<8x128xf32>
    %221 = vector.broadcast %8 : vector<1x128xf32> to vector<8x128xf32>
    %222 = arith.addf %220, %221 : vector<8x128xf32>
    %cst_91 = arith.constant 5.000000e-01 : f32
    %223 = vector.broadcast %cst_91 : f32 to vector<8x128xf32>
    %224 = arith.mulf %223, %222 : vector<8x128xf32>
    %cst_92 = arith.constant 0.707106769 : f32
    %225 = vector.broadcast %cst_92 : f32 to vector<8x128xf32>
    %226 = arith.mulf %222, %225 : vector<8x128xf32>
    %cst_93 = arith.constant 0.000000e+00 : f32
    %227 = vector.broadcast %cst_93 : f32 to vector<8x128xf32>
    %228 = arith.cmpf oge, %226, %227 : vector<8x128xf32>
    %cst_94 = arith.constant 1.000000e+00 : f32
    %cst_95 = arith.constant -1.000000e+00 : f32
    %229 = vector.broadcast %cst_94 : f32 to vector<8x128xf32>
    %230 = vector.broadcast %cst_95 : f32 to vector<8x128xf32>
    %231 = arith.select %228, %229, %230 : vector<8x128xi1>, vector<8x128xf32>
    %232 = math.absf %226 : vector<8x128xf32>
    %cst_96 = arith.constant 0.327591091 : f32
    %233 = vector.broadcast %cst_96 : f32 to vector<8x128xf32>
    %234 = arith.mulf %233, %232 : vector<8x128xf32>
    %cst_97 = arith.constant 1.000000e+00 : f32
    %235 = vector.broadcast %cst_97 : f32 to vector<8x128xf32>
    %236 = arith.addf %235, %234 : vector<8x128xf32>
    %cst_98 = arith.constant 1.000000e+00 : f32
    %237 = vector.broadcast %cst_98 : f32 to vector<8x128xf32>
    %238 = arith.divf %237, %236 : vector<8x128xf32>
    %cst_99 = arith.constant 1.06140542 : f32
    %239 = vector.broadcast %cst_99 : f32 to vector<8x128xf32>
    %240 = arith.mulf %238, %239 : vector<8x128xf32>
    %cst_100 = arith.constant -1.45315206 : f32
    %241 = vector.broadcast %cst_100 : f32 to vector<8x128xf32>
    %242 = arith.addf %241, %240 : vector<8x128xf32>
    %243 = arith.mulf %238, %242 : vector<8x128xf32>
    %cst_101 = arith.constant 1.42141378 : f32
    %244 = vector.broadcast %cst_101 : f32 to vector<8x128xf32>
    %245 = arith.addf %244, %243 : vector<8x128xf32>
    %246 = arith.mulf %238, %245 : vector<8x128xf32>
    %cst_102 = arith.constant -0.284496725 : f32
    %247 = vector.broadcast %cst_102 : f32 to vector<8x128xf32>
    %248 = arith.addf %247, %246 : vector<8x128xf32>
    %249 = arith.mulf %238, %248 : vector<8x128xf32>
    %cst_103 = arith.constant 0.254829586 : f32
    %250 = vector.broadcast %cst_103 : f32 to vector<8x128xf32>
    %251 = arith.addf %250, %249 : vector<8x128xf32>
    %252 = arith.mulf %238, %251 : vector<8x128xf32>
    %cst_104 = arith.constant 0.000000e+00 : f32
    %253 = vector.broadcast %cst_104 : f32 to vector<8x128xf32>
    %254 = arith.subf %253, %232 : vector<8x128xf32>
    %255 = arith.mulf %254, %232 : vector<8x128xf32>
    %256 = math.exp %255 : vector<8x128xf32>
    %257 = arith.mulf %252, %256 : vector<8x128xf32>
    %cst_105 = arith.constant 1.000000e+00 : f32
    %258 = vector.broadcast %cst_105 : f32 to vector<8x128xf32>
    %259 = arith.subf %258, %257 : vector<8x128xf32>
    %260 = arith.mulf %231, %259 : vector<8x128xf32>
    %cst_106 = arith.constant 1.000000e+00 : f32
    %261 = vector.broadcast %cst_106 : f32 to vector<8x128xf32>
    %262 = arith.addf %261, %260 : vector<8x128xf32>
    %263 = arith.mulf %224, %262 : vector<8x128xf32>
    %cst_107 = arith.constant dense<0.000000e+00> : vector<8x32xf32>
    %264 = tpu.matmul %263, %15, %cst_107 {dimension_numbers = #tpu.dot_dimension_numbers<[1], [0], [0], [1], [0, 0, 1, 1], [], []>} : vector<8x128xf32>, vector<128x32xf32>, vector<8x32xf32> -> vector<8x32xf32>
    %265 = arith.addf %197, %264 : vector<8x32xf32>
    %266 = vector.broadcast %9 : vector<1x32xf32> to vector<8x32xf32>
    %267 = arith.addf %265, %266 : vector<8x32xf32>
    %cst_108 = arith.constant dense<0.000000e+00> : vector<8xf32>
    %268 = vector.multi_reduction <add>, %267, %cst_108 [1] : vector<8x32xf32> to vector<8xf32>
    %269 = vector.shape_cast %268 : vector<8xf32> to vector<8x1xf32>
    %cst_109 = arith.constant 3.200000e+01 : f32
    %270 = vector.broadcast %cst_109 : f32 to vector<8x1xf32>
    %271 = arith.divf %269, %270 : vector<8x1xf32>
    %272 = vector.broadcast %271 : vector<8x1xf32> to vector<8x32xf32>
    %273 = arith.subf %267, %272 : vector<8x32xf32>
    %274 = arith.mulf %273, %273 : vector<8x32xf32>
    %cst_110 = arith.constant dense<0.000000e+00> : vector<8xf32>
    %275 = vector.multi_reduction <add>, %274, %cst_110 [1] : vector<8x32xf32> to vector<8xf32>
    %276 = vector.shape_cast %275 : vector<8xf32> to vector<8x1xf32>
    %cst_111 = arith.constant 3.200000e+01 : f32
    %277 = vector.broadcast %cst_111 : f32 to vector<8x1xf32>
    %278 = arith.divf %276, %277 : vector<8x1xf32>
    %279 = vector.broadcast %271 : vector<8x1xf32> to vector<8x32xf32>
    %280 = arith.subf %267, %279 : vector<8x32xf32>
    %cst_112 = arith.constant 9.99999974E-6 : f32
    %281 = vector.broadcast %cst_112 : f32 to vector<8x1xf32>
    %282 = arith.addf %278, %281 : vector<8x1xf32>
    %283 = math.rsqrt %282 : vector<8x1xf32>
    %284 = vector.broadcast %283 : vector<8x1xf32> to vector<8x32xf32>
    %285 = arith.mulf %280, %284 : vector<8x32xf32>
    %286 = vector.broadcast %0 : vector<1x32xf32> to vector<8x32xf32>
    %287 = arith.mulf %285, %286 : vector<8x32xf32>
    %288 = vector.broadcast %1 : vector<1x32xf32> to vector<8x32xf32>
    %289 = arith.addf %287, %288 : vector<8x32xf32>
    %cst_113 = arith.constant dense<0.000000e+00> : vector<8xf32>
    %290 = vector.multi_reduction <add>, %65, %cst_113 [1] : vector<8x32xf32> to vector<8xf32>
    %291 = vector.shape_cast %290 : vector<8xf32> to vector<8x1xf32>
    %cst_114 = arith.constant 3.200000e+01 : f32
    %292 = vector.broadcast %cst_114 : f32 to vector<8x1xf32>
    %293 = arith.divf %291, %292 : vector<8x1xf32>
    %294 = vector.broadcast %293 : vector<8x1xf32> to vector<8x32xf32>
    %295 = arith.subf %65, %294 : vector<8x32xf32>
    %296 = arith.mulf %295, %295 : vector<8x32xf32>
    %cst_115 = arith.constant dense<0.000000e+00> : vector<8xf32>
    %297 = vector.multi_reduction <add>, %296, %cst_115 [1] : vector<8x32xf32> to vector<8xf32>
    %298 = vector.shape_cast %297 : vector<8xf32> to vector<8x1xf32>
    %cst_116 = arith.constant 3.200000e+01 : f32
    %299 = vector.broadcast %cst_116 : f32 to vector<8x1xf32>
    %300 = arith.divf %298, %299 : vector<8x1xf32>
    %301 = vector.broadcast %293 : vector<8x1xf32> to vector<8x32xf32>
    %302 = arith.subf %65, %301 : vector<8x32xf32>
    %cst_117 = arith.constant 9.99999974E-6 : f32
    %303 = vector.broadcast %cst_117 : f32 to vector<8x1xf32>
    %304 = arith.addf %300, %303 : vector<8x1xf32>
    %305 = math.rsqrt %304 : vector<8x1xf32>
    %306 = vector.broadcast %305 : vector<8x1xf32> to vector<8x32xf32>
    %307 = arith.mulf %302, %306 : vector<8x32xf32>
    %308 = vector.broadcast %0 : vector<1x32xf32> to vector<8x32xf32>
    %309 = arith.mulf %307, %308 : vector<8x32xf32>
    %310 = vector.broadcast %1 : vector<1x32xf32> to vector<8x32xf32>
    %311 = arith.addf %309, %310 : vector<8x32xf32>
    %cst_118 = arith.constant dense<0.000000e+00> : vector<8xf32>
    %312 = vector.multi_reduction <add>, %87, %cst_118 [1] : vector<8x32xf32> to vector<8xf32>
    %313 = vector.shape_cast %312 : vector<8xf32> to vector<8x1xf32>
    %cst_119 = arith.constant 3.200000e+01 : f32
    %314 = vector.broadcast %cst_119 : f32 to vector<8x1xf32>
    %315 = arith.divf %313, %314 : vector<8x1xf32>
    %316 = vector.broadcast %315 : vector<8x1xf32> to vector<8x32xf32>
    %317 = arith.subf %87, %316 : vector<8x32xf32>
    %318 = arith.mulf %317, %317 : vector<8x32xf32>
    %cst_120 = arith.constant dense<0.000000e+00> : vector<8xf32>
    %319 = vector.multi_reduction <add>, %318, %cst_120 [1] : vector<8x32xf32> to vector<8xf32>
    %320 = vector.shape_cast %319 : vector<8xf32> to vector<8x1xf32>
    %cst_121 = arith.constant 3.200000e+01 : f32
    %321 = vector.broadcast %cst_121 : f32 to vector<8x1xf32>
    %322 = arith.divf %320, %321 : vector<8x1xf32>
    %323 = vector.broadcast %315 : vector<8x1xf32> to vector<8x32xf32>
    %324 = arith.subf %87, %323 : vector<8x32xf32>
    %cst_122 = arith.constant 9.99999974E-6 : f32
    %325 = vector.broadcast %cst_122 : f32 to vector<8x1xf32>
    %326 = arith.addf %322, %325 : vector<8x1xf32>
    %327 = math.rsqrt %326 : vector<8x1xf32>
    %328 = vector.broadcast %327 : vector<8x1xf32> to vector<8x32xf32>
    %329 = arith.mulf %324, %328 : vector<8x32xf32>
    %330 = vector.broadcast %0 : vector<1x32xf32> to vector<8x32xf32>
    %331 = arith.mulf %329, %330 : vector<8x32xf32>
    %332 = vector.broadcast %1 : vector<1x32xf32> to vector<8x32xf32>
    %333 = arith.addf %331, %332 : vector<8x32xf32>
    %cst_123 = arith.constant dense<0.000000e+00> : vector<8x32xf32>
    %334 = tpu.matmul %289, %10, %cst_123 {dimension_numbers = #tpu.dot_dimension_numbers<[1], [0], [0], [1], [0, 0, 1, 1], [], []>} : vector<8x32xf32>, vector<32x32xf32>, vector<8x32xf32> -> vector<8x32xf32>
    %335 = vector.broadcast %4 : vector<1x32xf32> to vector<8x32xf32>
    %336 = arith.addf %334, %335 : vector<8x32xf32>
    %cst_124 = arith.constant dense<0.000000e+00> : vector<8x32xf32>
    %337 = tpu.matmul %311, %11, %cst_124 {dimension_numbers = #tpu.dot_dimension_numbers<[1], [0], [0], [1], [0, 0, 1, 1], [], []>} : vector<8x32xf32>, vector<32x32xf32>, vector<8x32xf32> -> vector<8x32xf32>
    %338 = vector.broadcast %5 : vector<1x32xf32> to vector<8x32xf32>
    %339 = arith.addf %337, %338 : vector<8x32xf32>
    %cst_125 = arith.constant dense<0.000000e+00> : vector<8x32xf32>
    %340 = tpu.matmul %333, %12, %cst_125 {dimension_numbers = #tpu.dot_dimension_numbers<[1], [0], [0], [1], [0, 0, 1, 1], [], []>} : vector<8x32xf32>, vector<32x32xf32>, vector<8x32xf32> -> vector<8x32xf32>
    %341 = vector.broadcast %6 : vector<1x32xf32> to vector<8x32xf32>
    %342 = arith.addf %340, %341 : vector<8x32xf32>
    %343 = vector.extract_strided_slice %336 {offsets = [0, 0], sizes = [8, 8], strides = [1, 1]} : vector<8x32xf32> to vector<8x8xf32>
    %344 = vector.shape_cast %343 : vector<8x8xf32> to vector<1x8x8xf32>
    %345 = vector.extract_strided_slice %339 {offsets = [0, 0], sizes = [8, 8], strides = [1, 1]} : vector<8x32xf32> to vector<8x8xf32>
    %346 = vector.shape_cast %345 : vector<8x8xf32> to vector<1x8x8xf32>
    %347 = vector.extract_strided_slice %342 {offsets = [0, 0], sizes = [8, 8], strides = [1, 1]} : vector<8x32xf32> to vector<8x8xf32>
    %348 = vector.shape_cast %347 : vector<8x8xf32> to vector<1x8x8xf32>
    %cst_126 = arith.constant dense<0.000000e+00> : vector<1x8x8xf32>
    %349 = tpu.matmul %344, %346, %cst_126 {dimension_numbers = #tpu.dot_dimension_numbers<[2], [2], [1], [1], [0, 0, 0, 1, 1, 1], [0], [0]>} : vector<1x8x8xf32>, vector<1x8x8xf32>, vector<1x8x8xf32> -> vector<1x8x8xf32>
    %cst_127 = arith.constant dense<0xFF800000> : vector<1x8xf32>
    %350 = vector.multi_reduction <maximumf>, %349, %cst_127 [2] : vector<1x8x8xf32> to vector<1x8xf32>
    %351 = vector.shape_cast %350 : vector<1x8xf32> to vector<1x8x1xf32>
    %352 = vector.broadcast %351 : vector<1x8x1xf32> to vector<1x8x8xf32>
    %353 = arith.subf %349, %352 : vector<1x8x8xf32>
    %354 = math.exp %353 : vector<1x8x8xf32>
    %cst_128 = arith.constant dense<0.000000e+00> : vector<1x8xf32>
    %355 = vector.multi_reduction <add>, %354, %cst_128 [2] : vector<1x8x8xf32> to vector<1x8xf32>
    %356 = vector.shape_cast %355 : vector<1x8xf32> to vector<1x8x1xf32>
    %357 = tpu.reciprocal %356 {approx = true} : vector<1x8x1xf32> -> vector<1x8x1xf32>
    %358 = arith.mulf %356, %357 : vector<1x8x1xf32>
    %cst_129 = arith.constant 2.000000e+00 : f32
    %359 = vector.broadcast %cst_129 : f32 to vector<1x8x1xf32>
    %360 = arith.subf %359, %358 : vector<1x8x1xf32>
    %361 = arith.mulf %357, %360 : vector<1x8x1xf32>
    %362 = vector.broadcast %361 : vector<1x8x1xf32> to vector<1x8x8xf32>
    %363 = arith.mulf %354, %362 : vector<1x8x8xf32>
    %cst_130 = arith.constant dense<0.000000e+00> : vector<1x8x8xf32>
    %364 = tpu.matmul %363, %348, %cst_130 {dimension_numbers = #tpu.dot_dimension_numbers<[2], [1], [1], [2], [0, 0, 0, 1, 1, 2], [0], [0]>} : vector<1x8x8xf32>, vector<1x8x8xf32>, vector<1x8x8xf32> -> vector<1x8x8xf32>
    %365 = vector.shape_cast %364 : vector<1x8x8xf32> to vector<8x8xf32>
    %c0_131 = arith.constant 0 : index
    %c0_132 = arith.constant 0 : index
    %366 = vector.load %arg21[%c0_131, %c0_132] : memref<8x32xf32, #tpu.memory_space<vmem>>, vector<8x8xf32>
    tpu.vector_store %arg21[%c0_131, %c0_132], %365 {strides = array<i32>} : memref<8x32xf32, #tpu.memory_space<vmem>>, vector<8x8xf32>,
    %367 = vector.extract_strided_slice %336 {offsets = [0, 8], sizes = [8, 8], strides = [1, 1]} : vector<8x32xf32> to vector<8x8xf32>
    %368 = vector.shape_cast %367 : vector<8x8xf32> to vector<1x8x8xf32>
    %369 = vector.extract_strided_slice %339 {offsets = [0, 8], sizes = [8, 8], strides = [1, 1]} : vector<8x32xf32> to vector<8x8xf32>
    %370 = vector.shape_cast %369 : vector<8x8xf32> to vector<1x8x8xf32>
    %371 = vector.extract_strided_slice %342 {offsets = [0, 8], sizes = [8, 8], strides = [1, 1]} : vector<8x32xf32> to vector<8x8xf32>
    %372 = vector.shape_cast %371 : vector<8x8xf32> to vector<1x8x8xf32>
    %cst_133 = arith.constant dense<0.000000e+00> : vector<1x8x8xf32>
    %373 = tpu.matmul %368, %370, %cst_133 {dimension_numbers = #tpu.dot_dimension_numbers<[2], [2], [1], [1], [0, 0, 0, 1, 1, 1], [0], [0]>} : vector<1x8x8xf32>, vector<1x8x8xf32>, vector<1x8x8xf32> -> vector<1x8x8xf32>
    %cst_134 = arith.constant dense<0xFF800000> : vector<1x8xf32>
    %374 = vector.multi_reduction <maximumf>, %373, %cst_134 [2] : vector<1x8x8xf32> to vector<1x8xf32>
    %375 = vector.shape_cast %374 : vector<1x8xf32> to vector<1x8x1xf32>
    %376 = vector.broadcast %375 : vector<1x8x1xf32> to vector<1x8x8xf32>
    %377 = arith.subf %373, %376 : vector<1x8x8xf32>
    %378 = math.exp %377 : vector<1x8x8xf32>
    %cst_135 = arith.constant dense<0.000000e+00> : vector<1x8xf32>
    %379 = vector.multi_reduction <add>, %378, %cst_135 [2] : vector<1x8x8xf32> to vector<1x8xf32>
    %380 = vector.shape_cast %379 : vector<1x8xf32> to vector<1x8x1xf32>
    %381 = tpu.reciprocal %380 {approx = true} : vector<1x8x1xf32> -> vector<1x8x1xf32>
    %382 = arith.mulf %380, %381 : vector<1x8x1xf32>
    %cst_136 = arith.constant 2.000000e+00 : f32
    %383 = vector.broadcast %cst_136 : f32 to vector<1x8x1xf32>
    %384 = arith.subf %383, %382 : vector<1x8x1xf32>
    %385 = arith.mulf %381, %384 : vector<1x8x1xf32>
    %386 = vector.broadcast %385 : vector<1x8x1xf32> to vector<1x8x8xf32>
    %387 = arith.mulf %378, %386 : vector<1x8x8xf32>
    %cst_137 = arith.constant dense<0.000000e+00> : vector<1x8x8xf32>
    %388 = tpu.matmul %387, %372, %cst_137 {dimension_numbers = #tpu.dot_dimension_numbers<[2], [1], [1], [2], [0, 0, 0, 1, 1, 2], [0], [0]>} : vector<1x8x8xf32>, vector<1x8x8xf32>, vector<1x8x8xf32> -> vector<1x8x8xf32>
    %389 = vector.shape_cast %388 : vector<1x8x8xf32> to vector<8x8xf32>
    %c0_138 = arith.constant 0 : index
    %c8_139 = arith.constant 8 : index
    %390 = vector.load %arg21[%c0_138, %c8_139] : memref<8x32xf32, #tpu.memory_space<vmem>>, vector<8x8xf32>
    tpu.vector_store %arg21[%c0_138, %c8_139], %389 {strides = array<i32>} : memref<8x32xf32, #tpu.memory_space<vmem>>, vector<8x8xf32>,
    %391 = vector.extract_strided_slice %336 {offsets = [0, 16], sizes = [8, 8], strides = [1, 1]} : vector<8x32xf32> to vector<8x8xf32>
    %392 = vector.shape_cast %391 : vector<8x8xf32> to vector<1x8x8xf32>
    %393 = vector.extract_strided_slice %339 {offsets = [0, 16], sizes = [8, 8], strides = [1, 1]} : vector<8x32xf32> to vector<8x8xf32>
    %394 = vector.shape_cast %393 : vector<8x8xf32> to vector<1x8x8xf32>
    %395 = vector.extract_strided_slice %342 {offsets = [0, 16], sizes = [8, 8], strides = [1, 1]} : vector<8x32xf32> to vector<8x8xf32>
    %396 = vector.shape_cast %395 : vector<8x8xf32> to vector<1x8x8xf32>
    %cst_140 = arith.constant dense<0.000000e+00> : vector<1x8x8xf32>
    %397 = tpu.matmul %392, %394, %cst_140 {dimension_numbers = #tpu.dot_dimension_numbers<[2], [2], [1], [1], [0, 0, 0, 1, 1, 1], [0], [0]>} : vector<1x8x8xf32>, vector<1x8x8xf32>, vector<1x8x8xf32> -> vector<1x8x8xf32>
    %cst_141 = arith.constant dense<0xFF800000> : vector<1x8xf32>
    %398 = vector.multi_reduction <maximumf>, %397, %cst_141 [2] : vector<1x8x8xf32> to vector<1x8xf32>
    %399 = vector.shape_cast %398 : vector<1x8xf32> to vector<1x8x1xf32>
    %400 = vector.broadcast %399 : vector<1x8x1xf32> to vector<1x8x8xf32>
    %401 = arith.subf %397, %400 : vector<1x8x8xf32>
    %402 = math.exp %401 : vector<1x8x8xf32>
    %cst_142 = arith.constant dense<0.000000e+00> : vector<1x8xf32>
    %403 = vector.multi_reduction <add>, %402, %cst_142 [2] : vector<1x8x8xf32> to vector<1x8xf32>
    %404 = vector.shape_cast %403 : vector<1x8xf32> to vector<1x8x1xf32>
    %405 = tpu.reciprocal %404 {approx = true} : vector<1x8x1xf32> -> vector<1x8x1xf32>
    %406 = arith.mulf %404, %405 : vector<1x8x1xf32>
    %cst_143 = arith.constant 2.000000e+00 : f32
    %407 = vector.broadcast %cst_143 : f32 to vector<1x8x1xf32>
    %408 = arith.subf %407, %406 : vector<1x8x1xf32>
    %409 = arith.mulf %405, %408 : vector<1x8x1xf32>
    %410 = vector.broadcast %409 : vector<1x8x1xf32> to vector<1x8x8xf32>
    %411 = arith.mulf %402, %410 : vector<1x8x8xf32>
    %cst_144 = arith.constant dense<0.000000e+00> : vector<1x8x8xf32>
    %412 = tpu.matmul %411, %396, %cst_144 {dimension_numbers = #tpu.dot_dimension_numbers<[2], [1], [1], [2], [0, 0, 0, 1, 1, 2], [0], [0]>} : vector<1x8x8xf32>, vector<1x8x8xf32>, vector<1x8x8xf32> -> vector<1x8x8xf32>
    %413 = vector.shape_cast %412 : vector<1x8x8xf32> to vector<8x8xf32>
    %c0_145 = arith.constant 0 : index
    %c16_146 = arith.constant 16 : index
    %414 = vector.load %arg21[%c0_145, %c16_146] : memref<8x32xf32, #tpu.memory_space<vmem>>, vector<8x8xf32>
    tpu.vector_store %arg21[%c0_145, %c16_146], %413 {strides = array<i32>} : memref<8x32xf32, #tpu.memory_space<vmem>>, vector<8x8xf32>,
    %415 = vector.extract_strided_slice %336 {offsets = [0, 24], sizes = [8, 8], strides = [1, 1]} : vector<8x32xf32> to vector<8x8xf32>
    %416 = vector.shape_cast %415 : vector<8x8xf32> to vector<1x8x8xf32>
    %417 = vector.extract_strided_slice %339 {offsets = [0, 24], sizes = [8, 8], strides = [1, 1]} : vector<8x32xf32> to vector<8x8xf32>
    %418 = vector.shape_cast %417 : vector<8x8xf32> to vector<1x8x8xf32>
    %419 = vector.extract_strided_slice %342 {offsets = [0, 24], sizes = [8, 8], strides = [1, 1]} : vector<8x32xf32> to vector<8x8xf32>
    %420 = vector.shape_cast %419 : vector<8x8xf32> to vector<1x8x8xf32>
    %cst_147 = arith.constant dense<0.000000e+00> : vector<1x8x8xf32>
    %421 = tpu.matmul %416, %418, %cst_147 {dimension_numbers = #tpu.dot_dimension_numbers<[2], [2], [1], [1], [0, 0, 0, 1, 1, 1], [0], [0]>} : vector<1x8x8xf32>, vector<1x8x8xf32>, vector<1x8x8xf32> -> vector<1x8x8xf32>
    %cst_148 = arith.constant dense<0xFF800000> : vector<1x8xf32>
    %422 = vector.multi_reduction <maximumf>, %421, %cst_148 [2] : vector<1x8x8xf32> to vector<1x8xf32>
    %423 = vector.shape_cast %422 : vector<1x8xf32> to vector<1x8x1xf32>
    %424 = vector.broadcast %423 : vector<1x8x1xf32> to vector<1x8x8xf32>
    %425 = arith.subf %421, %424 : vector<1x8x8xf32>
    %426 = math.exp %425 : vector<1x8x8xf32>
    %cst_149 = arith.constant dense<0.000000e+00> : vector<1x8xf32>
    %427 = vector.multi_reduction <add>, %426, %cst_149 [2] : vector<1x8x8xf32> to vector<1x8xf32>
    %428 = vector.shape_cast %427 : vector<1x8xf32> to vector<1x8x1xf32>
    %429 = tpu.reciprocal %428 {approx = true} : vector<1x8x1xf32> -> vector<1x8x1xf32>
    %430 = arith.mulf %428, %429 : vector<1x8x1xf32>
    %cst_150 = arith.constant 2.000000e+00 : f32
    %431 = vector.broadcast %cst_150 : f32 to vector<1x8x1xf32>
    %432 = arith.subf %431, %430 : vector<1x8x1xf32>
    %433 = arith.mulf %429, %432 : vector<1x8x1xf32>
    %434 = vector.broadcast %433 : vector<1x8x1xf32> to vector<1x8x8xf32>
    %435 = arith.mulf %426, %434 : vector<1x8x8xf32>
    %cst_151 = arith.constant dense<0.000000e+00> : vector<1x8x8xf32>
    %436 = tpu.matmul %435, %420, %cst_151 {dimension_numbers = #tpu.dot_dimension_numbers<[2], [1], [1], [2], [0, 0, 0, 1, 1, 2], [0], [0]>} : vector<1x8x8xf32>, vector<1x8x8xf32>, vector<1x8x8xf32> -> vector<1x8x8xf32>
    %437 = vector.shape_cast %436 : vector<1x8x8xf32> to vector<8x8xf32>
    %c0_152 = arith.constant 0 : index
    %c24_153 = arith.constant 24 : index
    %438 = vector.load %arg21[%c0_152, %c24_153] : memref<8x32xf32, #tpu.memory_space<vmem>>, vector<8x8xf32>
    tpu.vector_store %arg21[%c0_152, %c24_153], %437 {strides = array<i32>} : memref<8x32xf32, #tpu.memory_space<vmem>>, vector<8x8xf32>,
    %c0_154 = arith.constant 0 : index
    %c0_155 = arith.constant 0 : index
    %439 = vector.load %arg21[%c0_154, %c0_155] : memref<8x32xf32, #tpu.memory_space<vmem>>, vector<8x32xf32>
    %cst_156 = arith.constant dense<0.000000e+00> : vector<8x32xf32>
    %440 = tpu.matmul %439, %13, %cst_156 {dimension_numbers = #tpu.dot_dimension_numbers<[1], [0], [0], [1], [0, 0, 1, 1], [], []>} : vector<8x32xf32>, vector<32x32xf32>, vector<8x32xf32> -> vector<8x32xf32>
    %441 = vector.broadcast %7 : vector<1x32xf32> to vector<8x32xf32>
    %442 = arith.addf %440, %441 : vector<8x32xf32>
    %443 = arith.addf %289, %442 : vector<8x32xf32>
    %cst_157 = arith.constant dense<0.000000e+00> : vector<8xf32>
    %444 = vector.multi_reduction <add>, %443, %cst_157 [1] : vector<8x32xf32> to vector<8xf32>
    %445 = vector.shape_cast %444 : vector<8xf32> to vector<8x1xf32>
    %cst_158 = arith.constant 3.200000e+01 : f32
    %446 = vector.broadcast %cst_158 : f32 to vector<8x1xf32>
    %447 = arith.divf %445, %446 : vector<8x1xf32>
    %448 = vector.broadcast %447 : vector<8x1xf32> to vector<8x32xf32>
    %449 = arith.subf %443, %448 : vector<8x32xf32>
    %450 = arith.mulf %449, %449 : vector<8x32xf32>
    %cst_159 = arith.constant dense<0.000000e+00> : vector<8xf32>
    %451 = vector.multi_reduction <add>, %450, %cst_159 [1] : vector<8x32xf32> to vector<8xf32>
    %452 = vector.shape_cast %451 : vector<8xf32> to vector<8x1xf32>
    %cst_160 = arith.constant 3.200000e+01 : f32
    %453 = vector.broadcast %cst_160 : f32 to vector<8x1xf32>
    %454 = arith.divf %452, %453 : vector<8x1xf32>
    %455 = vector.broadcast %447 : vector<8x1xf32> to vector<8x32xf32>
    %456 = arith.subf %443, %455 : vector<8x32xf32>
    %cst_161 = arith.constant 9.99999974E-6 : f32
    %457 = vector.broadcast %cst_161 : f32 to vector<8x1xf32>
    %458 = arith.addf %454, %457 : vector<8x1xf32>
    %459 = math.rsqrt %458 : vector<8x1xf32>
    %460 = vector.broadcast %459 : vector<8x1xf32> to vector<8x32xf32>
    %461 = arith.mulf %456, %460 : vector<8x32xf32>
    %462 = vector.broadcast %2 : vector<1x32xf32> to vector<8x32xf32>
    %463 = arith.mulf %461, %462 : vector<8x32xf32>
    %464 = vector.broadcast %3 : vector<1x32xf32> to vector<8x32xf32>
    %465 = arith.addf %463, %464 : vector<8x32xf32>
    %cst_162 = arith.constant dense<0.000000e+00> : vector<8x128xf32>
    %466 = tpu.matmul %465, %14, %cst_162 {dimension_numbers = #tpu.dot_dimension_numbers<[1], [0], [0], [1], [0, 0, 1, 1], [], []>} : vector<8x32xf32>, vector<32x128xf32>, vector<8x128xf32> -> vector<8x128xf32>
    %467 = vector.broadcast %8 : vector<1x128xf32> to vector<8x128xf32>
    %468 = arith.addf %466, %467 : vector<8x128xf32>
    %cst_163 = arith.constant 5.000000e-01 : f32
    %469 = vector.broadcast %cst_163 : f32 to vector<8x128xf32>
    %470 = arith.mulf %469, %468 : vector<8x128xf32>
    %cst_164 = arith.constant 0.707106769 : f32
    %471 = vector.broadcast %cst_164 : f32 to vector<8x128xf32>
    %472 = arith.mulf %468, %471 : vector<8x128xf32>
    %cst_165 = arith.constant 0.000000e+00 : f32
    %473 = vector.broadcast %cst_165 : f32 to vector<8x128xf32>
    %474 = arith.cmpf oge, %472, %473 : vector<8x128xf32>
    %cst_166 = arith.constant 1.000000e+00 : f32
    %cst_167 = arith.constant -1.000000e+00 : f32
    %475 = vector.broadcast %cst_166 : f32 to vector<8x128xf32>
    %476 = vector.broadcast %cst_167 : f32 to vector<8x128xf32>
    %477 = arith.select %474, %475, %476 : vector<8x128xi1>, vector<8x128xf32>
    %478 = math.absf %472 : vector<8x128xf32>
    %cst_168 = arith.constant 0.327591091 : f32
    %479 = vector.broadcast %cst_168 : f32 to vector<8x128xf32>
    %480 = arith.mulf %479, %478 : vector<8x128xf32>
    %cst_169 = arith.constant 1.000000e+00 : f32
    %481 = vector.broadcast %cst_169 : f32 to vector<8x128xf32>
    %482 = arith.addf %481, %480 : vector<8x128xf32>
    %cst_170 = arith.constant 1.000000e+00 : f32
    %483 = vector.broadcast %cst_170 : f32 to vector<8x128xf32>
    %484 = arith.divf %483, %482 : vector<8x128xf32>
    %cst_171 = arith.constant 1.06140542 : f32
    %485 = vector.broadcast %cst_171 : f32 to vector<8x128xf32>
    %486 = arith.mulf %484, %485 : vector<8x128xf32>
    %cst_172 = arith.constant -1.45315206 : f32
    %487 = vector.broadcast %cst_172 : f32 to vector<8x128xf32>
    %488 = arith.addf %487, %486 : vector<8x128xf32>
    %489 = arith.mulf %484, %488 : vector<8x128xf32>
    %cst_173 = arith.constant 1.42141378 : f32
    %490 = vector.broadcast %cst_173 : f32 to vector<8x128xf32>
    %491 = arith.addf %490, %489 : vector<8x128xf32>
    %492 = arith.mulf %484, %491 : vector<8x128xf32>
    %cst_174 = arith.constant -0.284496725 : f32
    %493 = vector.broadcast %cst_174 : f32 to vector<8x128xf32>
    %494 = arith.addf %493, %492 : vector<8x128xf32>
    %495 = arith.mulf %484, %494 : vector<8x128xf32>
    %cst_175 = arith.constant 0.254829586 : f32
    %496 = vector.broadcast %cst_175 : f32 to vector<8x128xf32>
    %497 = arith.addf %496, %495 : vector<8x128xf32>
    %498 = arith.mulf %484, %497 : vector<8x128xf32>
    %cst_176 = arith.constant 0.000000e+00 : f32
    %499 = vector.broadcast %cst_176 : f32 to vector<8x128xf32>
    %500 = arith.subf %499, %478 : vector<8x128xf32>
    %501 = arith.mulf %500, %478 : vector<8x128xf32>
    %502 = math.exp %501 : vector<8x128xf32>
    %503 = arith.mulf %498, %502 : vector<8x128xf32>
    %cst_177 = arith.constant 1.000000e+00 : f32
    %504 = vector.broadcast %cst_177 : f32 to vector<8x128xf32>
    %505 = arith.subf %504, %503 : vector<8x128xf32>
    %506 = arith.mulf %477, %505 : vector<8x128xf32>
    %cst_178 = arith.constant 1.000000e+00 : f32
    %507 = vector.broadcast %cst_178 : f32 to vector<8x128xf32>
    %508 = arith.addf %507, %506 : vector<8x128xf32>
    %509 = arith.mulf %470, %508 : vector<8x128xf32>
    %cst_179 = arith.constant dense<0.000000e+00> : vector<8x32xf32>
    %510 = tpu.matmul %509, %15, %cst_179 {dimension_numbers = #tpu.dot_dimension_numbers<[1], [0], [0], [1], [0, 0, 1, 1], [], []>} : vector<8x128xf32>, vector<128x32xf32>, vector<8x32xf32> -> vector<8x32xf32>
    %511 = arith.addf %443, %510 : vector<8x32xf32>
    %512 = vector.broadcast %9 : vector<1x32xf32> to vector<8x32xf32>
    %513 = arith.addf %511, %512 : vector<8x32xf32>
    %514 = vector.shape_cast %513 : vector<8x32xf32> to vector<1x8x32xf32>
    %c0_180 = arith.constant 0 : index
    %c0_181 = arith.constant 0 : index
    %c0_182 = arith.constant 0 : index
    %515 = vector.load %arg20[%c0_180, %c0_181, %c0_182] : memref<1x8x32xf32, #tpu.memory_space<vmem>>, vector<1x8x32xf32>
    tpu.vector_store %arg20[%c0_180, %c0_181, %c0_182], %514 {strides = array<i32>} : memref<1x8x32xf32, #tpu.memory_space<vmem>>, vector<1x8x32xf32>,
    return
  }
  func.func @transform_0(%arg0: i32) -> (i32, i32, i32) {
    %c0_i32 = arith.constant 0 : i32
    %c0_i32_0 = arith.constant 0 : i32
    %c0_i32_1 = arith.constant 0 : i32
    return %arg0, %c0_i32, %c0_i32_0 : i32, i32, i32
  }
  func.func @transform_1(%arg0: i32) -> (i32, i32, i32) {
    %c0_i32 = arith.constant 0 : i32
    %c0_i32_0 = arith.constant 0 : i32
    %c0_i32_1 = arith.constant 0 : i32
    return %arg0, %c0_i32, %c0_i32_0 : i32, i32, i32
  }
  func.func @transform_2(%arg0: i32) -> (i32, i32, i32) {
    %c0_i32 = arith.constant 0 : i32
    %c0_i32_0 = arith.constant 0 : i32
    %c0_i32_1 = arith.constant 0 : i32
    return %arg0, %c0_i32, %c0_i32_0 : i32, i32, i32
  }
  func.func @transform_3(%arg0: i32) -> (i32, i32) {
    %c0_i32 = arith.constant 0 : i32
    %c0_i32_0 = arith.constant 0 : i32
    %c0_i32_1 = arith.constant 0 : i32
    return %c0_i32, %c0_i32_0 : i32, i32
  }
  func.func @transform_4(%arg0: i32) -> (i32, i32) {
    %c0_i32 = arith.constant 0 : i32
    %c0_i32_0 = arith.constant 0 : i32
    %c0_i32_1 = arith.constant 0 : i32
    return %c0_i32, %c0_i32_0 : i32, i32
  }
  func.func @transform_5(%arg0: i32) -> (i32, i32) {
    %c0_i32 = arith.constant 0 : i32
    %c0_i32_0 = arith.constant 0 : i32
    %c0_i32_1 = arith.constant 0 : i32
    return %c0_i32, %c0_i32_0 : i32, i32
  }
  func.func @transform_6(%arg0: i32) -> (i32, i32) {
    %c0_i32 = arith.constant 0 : i32
    %c0_i32_0 = arith.constant 0 : i32
    %c0_i32_1 = arith.constant 0 : i32
    return %c0_i32, %c0_i32_0 : i32, i32
  }
  func.func @transform_7(%arg0: i32) -> (i32, i32) {
    %c0_i32 = arith.constant 0 : i32
    %c0_i32_0 = arith.constant 0 : i32
    %c0_i32_1 = arith.constant 0 : i32
    return %c0_i32, %c0_i32_0 : i32, i32
  }
  func.func @transform_8(%arg0: i32) -> (i32, i32) {
    %c0_i32 = arith.constant 0 : i32
    %c0_i32_0 = arith.constant 0 : i32
    %c0_i32_1 = arith.constant 0 : i32
    return %c0_i32, %c0_i32_0 : i32, i32
  }
  func.func @transform_9(%arg0: i32) -> (i32, i32) {
    %c0_i32 = arith.constant 0 : i32
    %c0_i32_0 = arith.constant 0 : i32
    %c0_i32_1 = arith.constant 0 : i32
    return %c0_i32, %c0_i32_0 : i32, i32
  }
  func.func @transform_10(%arg0: i32) -> (i32, i32) {
    %c0_i32 = arith.constant 0 : i32
    %c0_i32_0 = arith.constant 0 : i32
    %c0_i32_1 = arith.constant 0 : i32
    return %c0_i32, %c0_i32_0 : i32, i32
  }
  func.func @transform_11(%arg0: i32) -> (i32, i32) {
    %c0_i32 = arith.constant 0 : i32
    %c0_i32_0 = arith.constant 0 : i32
    %c0_i32_1 = arith.constant 0 : i32
    return %c0_i32, %c0_i32_0 : i32, i32
  }
  func.func @transform_12(%arg0: i32) -> (i32, i32) {
    %c0_i32 = arith.constant 0 : i32
    %c0_i32_0 = arith.constant 0 : i32
    %c0_i32_1 = arith.constant 0 : i32
    return %c0_i32, %c0_i32_0 : i32, i32
  }
  func.func @transform_13(%arg0: i32) -> (i32, i32) {
    %c0_i32 = arith.constant 0 : i32
    %c0_i32_0 = arith.constant 0 : i32
    %c0_i32_1 = arith.constant 0 : i32
    return %c0_i32, %c0_i32_0 : i32, i32
  }
  func.func @transform_14(%arg0: i32) -> (i32, i32) {
    %c0_i32 = arith.constant 0 : i32
    %c0_i32_0 = arith.constant 0 : i32
    %c0_i32_1 = arith.constant 0 : i32
    return %c0_i32, %c0_i32_0 : i32, i32
  }
  func.func @transform_15(%arg0: i32) -> (i32, i32) {
    %c0_i32 = arith.constant 0 : i32
    %c0_i32_0 = arith.constant 0 : i32
    %c0_i32_1 = arith.constant 0 : i32
    return %c0_i32, %c0_i32_0 : i32, i32
  }
  func.func @transform_16(%arg0: i32) -> (i32, i32) {
    %c0_i32 = arith.constant 0 : i32
    %c0_i32_0 = arith.constant 0 : i32
    %c0_i32_1 = arith.constant 0 : i32
    return %c0_i32, %c0_i32_0 : i32, i32
  }
  func.func @transform_17(%arg0: i32) -> (i32, i32) {
    %c0_i32 = arith.constant 0 : i32
    %c0_i32_0 = arith.constant 0 : i32
    %c0_i32_1 = arith.constant 0 : i32
    return %c0_i32, %c0_i32_0 : i32, i32
  }
  func.func @transform_18(%arg0: i32) -> (i32, i32) {
    %c0_i32 = arith.constant 0 : i32
    %c0_i32_0 = arith.constant 0 : i32
    %c0_i32_1 = arith.constant 0 : i32
    return %c0_i32, %c0_i32_0 : i32, i32
  }
  func.func @transform_19(%arg0: i32) -> (i32, i32, i32) {
    %c0_i32 = arith.constant 0 : i32
    %c0_i32_0 = arith.constant 0 : i32
    %c0_i32_1 = arith.constant 0 : i32
    return %arg0, %c0_i32, %c0_i32_0 : i32, i32, i32
  }
}

</mosaic_0001>

<bundles_post_ra>
// kernel: tpu_custom_call.1
= control target key start
LH: loop header
LB: loop body
LE: loop exit
PB: predicated region body
PF: predicated region fallthrough
CT: control target
= control target key end

     0   :  { %s5027_s0 = inlined_call_operand.hbm [shape: f32[2,8,32], index: 0, kind: input, shape index: {}]   ;;  %s5028_s1 = inlined_call_operand.hbm [shape: f32[2,8,32], index: 1, kind: input, shape index: {}]   ;;  %s5029_s2 = inlined_call_operand.hbm [shape: f32[2,8,32], index: 2, kind: input, shape index: {}]   ;;  %s5030_s3 = inlined_call_operand.vmem [shape: f32[1,32], index: 3, kind: input, shape index: {}]   ;;  %s5031_s4 = inlined_call_operand.vmem [shape: f32[1,32], index: 4, kind: input, shape index: {}]   ;;  %s5032_s5 = inlined_call_operand.vmem [shape: f32[1,32], index: 5, kind: input, shape index: {}]   ;;  %s5033_s6 = inlined_call_operand.vmem [shape: f32[1,32], index: 6, kind: input, shape index: {}]   ;;  %s5034_s7 = inlined_call_operand.vmem [shape: f32[32,32], index: 7, kind: input, shape index: {}]   ;;  %s5035_s8 = inlined_call_operand.vmem [shape: f32[32,32], index: 8, kind: input, shape index: {}]   ;;  %s5036_s9 = inlined_call_operand.vmem [shape: f32[32,32], index: 9, kind: input, shape index: {}]   ;;  %s5037_s10 = inlined_call_operand.vmem [shape: f32[1,32], index: 10, kind: input, shape index: {}]   ;;  %s5038_s11 = inlined_call_operand.vmem [shape: f32[1,32], index: 11, kind: input, shape index: {}]   ;;  %s5039_s12 = inlined_call_operand.vmem [shape: f32[1,32], index: 12, kind: input, shape index: {}]   ;;  %s5040_s13 = inlined_call_operand.vmem [shape: f32[32,32], index: 13, kind: input, shape index: {}]   ;;  %s5041_s14 = inlined_call_operand.vmem [shape: f32[1,32], index: 14, kind: input, shape index: {}]   ;;  %s5042_s15 = inlined_call_operand.vmem [shape: f32[32,128], index: 15, kind: input, shape index: {}]   ;;  %s5043_s16 = inlined_call_operand.vmem [shape: f32[1,128], index: 16, kind: input, shape index: {}]   ;;  %s5044_s17 = inlined_call_operand.vmem [shape: f32[128,32], index: 17, kind: input, shape index: {}]   ;;  %s5045_s18 = inlined_call_operand.vmem [shape: f32[1,32], index: 18, kind: input, shape index: {}]   ;;  %s5046_s19 = inlined_call_operand.hbm [shape: f32[2,8,32], index: 19, kind: output, shape index: {}]  }
   0x1   :  { %5068 = sst [smem:[#allocation20_spill]] %s5027_s0 }
   0x2   :  { %5069 = sst [smem:[#allocation21_spill]] %s5028_s1 }
   0x3   :  { %5070 = sst [smem:[#allocation22_spill]] %s5029_s2 }
   0x4   :  { %5071 = sst [smem:[#allocation23_spill]] %s5030_s3 }
   0x5   :  { %5072 = sst [smem:[#allocation24_spill]] %s5032_s5 }
   0x6   :  { %5073 = sst [smem:[#allocation25_spill]] %s5033_s6 }
   0x7   :  { %5074 = sst [smem:[#allocation26_spill]] %s5042_s15 }
   0x8   :  { %5075 = sst [smem:[#allocation27_spill]] %s5043_s16 }
   0x9   :  { %5076 = sst [smem:[#allocation28_spill]] %s5044_s17 }
   0xa   :  { %5077 = sst [smem:[#allocation29_spill]] %s5045_s18 }
   0xb   :  { %5078 = sst [smem:[#allocation30_spill]] %s5046_s19 }
   0xc   :  { %24 = vsyncpa [#allocation4], 0 }
   0xd   :  { %26 = vsyncpa [#allocation4 + $0x1], 0 }
   0xe   :  { %27 = vsyncpa [#allocation7], 0 }
   0xf   :  { %29 = vsyncpa [#allocation7 + $0x1], 0 }
  0x10   :  { %30 = vsyncpa [#allocation5], 0 }
  0x11   :  { %32 = vsyncpa [#allocation5 + $0x1], 0  ;;  %s4296_s0 = smov 0   ;;  %s4298_s30 = smov 0  }
  0x12   :  { %s4300_s20 = smov 0   ;;  %s4302_s21 = smov 0  }
  0x13 LB: > { %5079 = sst [smem:[#allocation13_spill]] %s4168_s0  ;;  %s4317_s1 = sadd.s32 4294967295, %s4180_s21   ;;  %s4180_s21 = sphi %s4302_s21, %s5119_s21   ;;  %s4176_s20 = sphi %s4300_s20, %s5121_s20   ;;  %s4172_s30 = sphi %s4298_s30, %s5123_s30   ;;  %s4168_s0 = sphi %s4296_s0, %s5122_s0  }
  0x14   : > { %5080 = sst [smem:[#allocation14_spill]] %s4176_s20  ;;  %s3352_s22 = sadd.s32 4294967294, %s4180_s21  }
  0x15   : > { %5081 = sst [smem:[#allocation15_spill]] %s4180_s21  ;;  %s4321_s2 = sadd.s32 1, %s4180_s21  }
  0x16   : > { %5082 = sst [smem:[#allocation16_spill]] %s4321_s2  ;;  %s45_s23 = sadd.s32 1, %s4176_s20 }
  0x17   : > { %s42_s24 = ssub.s32 %s4180_s21, %s4321_s2  ;;  %p52_p0 = scmp.ne.s32.totalorder %s4176_s20, %s4172_s30 }
  0x18   : > { %p43_p1 = scmp.eq.s32.totalorder %s42_s24, 0  ;;  %p53_p2 = scmp.eq.s32.totalorder %s4180_s21, 0 }
  0x19   : > { %p58_p3 = scmp.ne.s32.totalorder %s4172_s30, %s4168_s0  ;;  %p59_p4 = scmp.eq.s32.totalorder %s4317_s1, 0 }
  0x1a   : > { %s4333_s25 = scalar_select %p43_p1, %s4176_s20, %s45_s23  }
  0x1b   : > { %p54_p5 = por %p53_p2, %p52_p0  ;;  %p4335_p6 = por %p59_p4, %p58_p3 }
  0x1c   : > { %5083 = sst [smem:[#allocation17_spill]] %s4333_s25  ;;  %p470_p7 = scmp.eq.s32.totalorder %s4317_s1, 1 }
  0x1d   : > { %s5084_s3 = scalar_select %p4335_p6, 1, 0 }
  0x1e   : > { %p476_p8 = scmp.eq.s32.totalorder %s3352_s22, 1  ;;  %p3920_p10 = scmp.lt.s32.totalorder %s4180_s21, 2 }
  0x1f   : > { %p4342_p11 = por %p470_p7, %p52_p0  ;;  %s5057_s28 = sand.u32 1, %s4176_s20  }
  0x20   : > { %p4346_p12 = por %p476_p8, %p58_p3  ;;  %s4352_s29 = sshll.u32 %s4180_s21, 7 }
  0x21   : > { %s5085_s26 = scalar_select %p4342_p11, 1, 0 }
  0x22   : > { %s5087_s27 = scalar_select %p4346_p12, 1, 0 }
  0x23   : > { %5086 = sst [smem:[#allocation18_spill]] %s5085_s26  ;;  %s4356_s23 = sshll.u32 %s5057_s28, 3 }
  0x24   : > { %5088 = sst [smem:[#allocation19_spill]] %s5087_s27  ;;  %p4358_p13 = pnand %p3920_p10, %p54_p5 }
  0x25   : > { %s562_s24 = sand.u32 1, %s4180_s21   ;;  %s5090_s0 = sld [smem:[#allocation21_spill]] }
  0x26   : > { %s5089_s22 = scalar_select %p4358_p13, 1, 0 }
  0x27   : > { %s566_s27 = scalar_lea.vmem [#allocation6], %s4356_s23  ;;  %s4373_s28 = scalar_lea.sflag [#allocation7], %s562_s24 }
  0x28   : > { %s573_s18 = sshll.u32 %s566_s27, 4  ;;  %p4379_p2 = pneg %p4358_p13  ;;  %s4370_s18 = int_to_ptr.vmem [resolvable:$true] %s573_s18 }
  0x2b   : > { %s5091_s19 = smov %s5090_s0  ;;  %s4367_s26 = scalar_lea.hbm %s5090_s0, %s4352_s29 }
  0x2c   : > { %s4020_s16 = scalar_lea.hbm %s4367_s26, 128  ;;  %s4025_s25 = scalar_lea.hbm %s5091_s19, 256 }
  0x2d   : > { %p4021_p1 = scmp.ne.s32.totalorder %s4367_s26, %s4020_s16  ;;  %p4026_p5 = scmp.lt.u32.totalorder %s4367_s26, %s5091_s19 }
  0x2e   : > { %p4027_p7 = scmp.lt.u32.totalorder %s4025_s25, %s4020_s16  ;;  %p4029_p10 = scmp.lt.u32.totalorder %s4020_s16, %s4367_s26 }
  0x2f   : > { %p4023_p3 = pnand %p4379_p2, %p4021_p1 }
  0x30   : > { %p4028_p8 = por %p4027_p7, %p4026_p5 }
  0x31   : > { %p4024_p4 = pneg %p4023_p3 }
  0x32   : > { %p4030_p9 = por %p4029_p10, %p4028_p8 }
  0x34   : > { %p4031_p0 = pnand %p4030_p9, %p4024_p4 }
  0x36   : > { %4034 = shalt.err (!%p4031_p0)
}
  0x37   : > { %s4035_s24 = scalar_lea.vmem %s4370_s18, 128  ;;  %s4182_s0 = smov [#allocation6]  }
  0x38   : > { %p4036_p1 = scmp.ne.s32.totalorder %s4370_s18, %s4035_s24  ;;  %s4040_s2 = sshll.u32 %s4182_s0, 4  ;;  %s4041_s2 = int_to_ptr.vmem [resolvable:$false] %s4040_s2 }
  0x39   : > { %s4042_s6 = scalar_lea.vmem %s4041_s2, 256  ;;  %p4043_p11 = scmp.lt.s32.totalorder %s4370_s18, %s4041_s2 }
  0x3a   : > { %p4038_p3 = pnand %p4036_p1, %p4379_p2  ;;  %p4044_p6 = scmp.lt.s32.totalorder %s4042_s6, %s4035_s24 }
  0x3c   : > { %p4039_p12 = pneg %p4038_p3  ;;  %p4045_p5 = por %p4044_p6, %p4043_p11 }
  0x3e   : > { %p4046_p7 = pnand %p4045_p5, %p4039_p12 }
  0x40   : > { %4049 = shalt.err (!%p4046_p7)
}
  0x41   : > { %3912 = dma.hbm_to_vmem [thread:$0]  (!%p4358_p13), %s4367_s26, 128, %s4370_s18, %s4373_s28  }
  0x42   : > { %p596_p9 = scmp.lt.s32.totalorder %s4180_s21, 3  ;;  %s5093_s27 = sld [smem:[#allocation20_spill]] }
  0x43   : > { %p5094_p6 = scmp.ge.s32.totalorder %s4180_s21, 1  ;;  %s548_s2 = scalar_lea.vmem [#allocation3], %s4356_s23 }
  0x44   : > { %s555_s6 = sshll.u32 %s548_s2, 4  ;;  %s5096_s19 = sand.u32 1, %s4176_s20   ;;  %s556_s6 = int_to_ptr.vmem [resolvable:$true] %s555_s6 }
  0x45   : > { %p4412_p11 = pnand %p5094_p6, %p596_p9  ;;  %s545_s18 = scalar_lea.sflag [#allocation4], %s5096_s19 }
  0x47   : > { %s5095_s0 = scalar_select %p4412_p11, 1, 0 }
  0x48   : > { %s4408_s24 = scalar_lea.hbm %s5093_s27, %s4352_s29  ;;  %s4055_s21 = scalar_lea.hbm %s5093_s27, 256 }
  0x49   : > { %s4050_s26 = scalar_lea.hbm %s4408_s24, 128  ;;  %p4056_p8 = scmp.lt.u32.totalorder %s4408_s24, %s5093_s27 }
  0x4a   : > { %p4051_p12 = scmp.ne.s32.totalorder %s4408_s24, %s4050_s26  ;;  %p4057_p10 = scmp.lt.u32.totalorder %s4055_s21, %s4050_s26 }
  0x4b   : > { %p4059_p3 = scmp.lt.u32.totalorder %s4050_s26, %s4408_s24 }
  0x4c   : > { %p4053_p0 = pnand %p4051_p12, %p4379_p2  ;;  %p4058_p1 = por %p4057_p10, %p4056_p8 }
  0x4e   : > { %p4054_p4 = pneg %p4053_p0  ;;  %p4060_p5 = por %p4059_p3, %p4058_p1 }
  0x50   : > { %p4061_p7 = pnand %p4060_p5, %p4054_p4 }
  0x52   : > { %4064 = shalt.err (!%p4061_p7)
}
  0x53   : > { %s4065_s19 = scalar_lea.vmem %s556_s6, 128  ;;  %s4183_s2 = smov [#allocation3]  }
  0x54   : > { %p4066_p9 = scmp.ne.s32.totalorder %s556_s6, %s4065_s19  ;;  %s4070_s20 = sshll.u32 %s4183_s2, 4  ;;  %s4071_s20 = int_to_ptr.vmem [resolvable:$false] %s4070_s20 }
  0x55   : > { %s4072_s16 = scalar_lea.vmem %s4071_s20, 256  ;;  %p4073_p0 = scmp.lt.s32.totalorder %s556_s6, %s4071_s20 }
  0x56   : > { %p4068_p6 = pnand %p4066_p9, %p4379_p2  ;;  %p4074_p11 = scmp.lt.s32.totalorder %s4072_s16, %s4065_s19 }
  0x58   : > { %p4069_p12 = pneg %p4068_p6  ;;  %p4075_p13 = por %p4074_p11, %p4073_p0 }
  0x5a   : > { %p4076_p8 = pnand %p4075_p13, %p4069_p12 }
  0x5c   : > { %4079 = shalt.err (!%p4076_p8)
}
  0x5d   : > { %p5097_p10 = scmp.ne.s32.totalorder %s5089_s22, 0  ;;  %s5098_s21 = sld [smem:[#allocation22_spill]] }
  0x5e   : > { %s584_s20 = scalar_lea.vmem [#allocation8], %s4356_s23 }
  0x5f   : > { %3909 = dma.hbm_to_vmem [thread:$0]  (!%p5097_p10), %s4408_s24, 128, %s556_s6, %s545_s18  }
  0x60   : > { %s591_s19 = sshll.u32 %s584_s20, 4  ;;  %s592_s19 = int_to_ptr.vmem [resolvable:$true] %s591_s19 }
  0x63   : > { %s5099_s26 = smov %s5098_s21  ;;  %s4440_s25 = scalar_lea.hbm %s5098_s21, %s4352_s29 }
  0x64   : > { %s4080_s2 = scalar_lea.hbm %s4440_s25, 128  ;;  %s4085_s24 = scalar_lea.hbm %s5099_s26, 256 }
  0x65   : > { %p4081_p13 = scmp.ne.s32.totalorder %s4440_s25, %s4080_s2  ;;  %p4086_p1 = scmp.lt.u32.totalorder %s4440_s25, %s5099_s26 }
  0x66   : > { %p4087_p3 = scmp.lt.u32.totalorder %s4085_s24, %s4080_s2  ;;  %p4089_p7 = scmp.lt.u32.totalorder %s4080_s2, %s4440_s25 }
  0x67   : > { %p4083_p11 = pnand %p4081_p13, %p4379_p2 }
  0x68   : > { %p4088_p5 = por %p4087_p3, %p4086_p1 }
  0x69   : > { %p4084_p4 = pneg %p4083_p11 }
  0x6a   : > { %p4090_p9 = por %p4089_p7, %p4088_p5 }
  0x6c   : > { %p4091_p6 = pnand %p4090_p9, %p4084_p4 }
  0x6e   : > { %4094 = shalt.err (!%p4091_p6)
}
  0x6f   : > { %s4095_s29 = scalar_lea.vmem %s592_s19, 128  ;;  %s4184_s23 = smov [#allocation8]  }
  0x70   : > { %p4096_p12 = scmp.ne.s32.totalorder %s592_s19, %s4095_s29  ;;  %s4100_s5 = sshll.u32 %s4184_s23, 4  ;;  %s4101_s5 = int_to_ptr.vmem [resolvable:$false] %s4100_s5 }
  0x71   : > { %s4102_s27 = scalar_lea.vmem %s4101_s5, 256  ;;  %p4103_p13 = scmp.lt.s32.totalorder %s592_s19, %s4101_s5 }
  0x72   : > { %p4098_p0 = pnand %p4096_p12, %p4379_p2  ;;  %p4104_p11 = scmp.lt.s32.totalorder %s4102_s27, %s4095_s29 }
  0x74   : > { %p4099_p8 = pneg %p4098_p0  ;;  %p4105_p10 = por %p4104_p11, %p4103_p13 }
  0x76   : > { %p4106_p1 = pnand %p4105_p10, %p4099_p8 }
  0x78   : > { %4109 = shalt.err (!%p4106_p1)
}
  0x79   : > { %p5100_p3 = scmp.ne.s32.totalorder %s5089_s22, 0  ;;  %p5101_p4 = scmp.ne.s32.totalorder %s5095_s0, 0 }
  0x7a   : > { %s4464_s17 = sand.u32 (!%p5101_p4), 1, %s4172_s30   ;;  %p5102_p2 = scmp.ne.s32.totalorder (!%p5101_p4), %s5084_s3, 0 }
  0x7b   : > { %3915 = dma.hbm_to_vmem [thread:$0]  (!%p5100_p3), %s4440_s25, 128, %s592_s19, %s4373_s28  }
  0x7c   : > { %600 = sbr.rel (%p5101_p4) target bundleno = 5308 (0x14bc), region = 96  ;;  %s4467_s15 = sshll.u32 (!%p5101_p4), %s4464_s17, 3 }
  0x7d   : > { %s603_s21 = scalar_lea.sflag (!%p5101_p4), [#allocation4], %s4464_s17  ;;  %s606_s20 = scalar_lea.vmem (!%p5101_p4), [#allocation3], %s4467_s15 }
  0x83   : > { %4155 = dma.done.wait (%p5102_p2), %s603_s21, 128  }
  0x84   : > { %4157 = vsyncadd (%p5102_p2), %s603_s21, 4294967168  ;;  %s611_s28 = sand.u32 1, %s4317_s1   ;;  %s615_s0 = scalar_lea.vmem [#allocation6], %s4467_s15 }
  0x85   : > { %s612_s22 = scalar_lea.sflag [#allocation7], %s611_s28 }
  0x86   : > { %4159 = dma.done.wait (%p5102_p2), %s612_s22, 256  }
  0x87   : > { %4161 = vsyncadd (%p5102_p2), %s612_s22, 4294967040  ;;  %vm738_vm0 = vcmask 261120   ;;  %v735_v0 = vld [vmem:[%s606_s20] sm:$0xff]  ;;  %v736_v1 = vld [vmem:[%s615_s0] sm:$0xff]  ;;  %s624_s25 = scalar_lea.vmem [#allocation8], %s4467_s15  ;;  %v4185_v19 = vmov 0.0|0.0  }
  0x88   : > { %v739_v2 = vsel %vm738_vm0, %v735_v0, 0.0  ;;  %v767_v3 = vsel %vm738_vm0, %v736_v1, 0.0  ;;  %v737_v4 = vld [vmem:[%s624_s25] sm:$0xff]  ;;  %v699_v16 = vld [vmem:[%s5034_s7] sm:$0xff]  ;;  %3790 = vmatprep.subr.bf16.mxu1 %v4185_v19  ;;  %v702_v21 = vld [vmem:[%s5034_s7 + $0x18] sm:$0xff]  ;;  %vm4186_vm1 = vmmov 0  }
  0x89   : > { %740 = vadd.xlane.f32.xlu0 %v739_v2  ;;  %v782_v5 = vsel %vm738_vm0, %v737_v4, 0.0  ;;  %v700_v17 = vld [vmem:[%s5034_s7 + $0x8] sm:$0xff]  ;;  %v701_v20 = vld [vmem:[%s5034_s7 + $0x10] sm:$0xff]  ;;  %v4187_v23 = vmov 0.0   ;;  %s5103_s27 = sld [smem:[#allocation23_spill]]  ;;  %v703_v38 = vld [vmem:[%s5035_s8] sm:$0xff] }
  0x8a   : > { %v4493_v18 = vpack.c.bf16 %v700_v17, %v699_v16  ;;  %v4504_v22 = vpack.c.bf16 %v702_v21, %v701_v20  ;;  %3538 = vmatprep.mubr.msk.f32.mxu1 %vm4186_vm1, %v4187_v23  ;;  %3573 = vmatprep.subr.mxu0 %v4187_v23  ;;  %v704_v39 = vld [vmem:[%s5035_s8 + $0x8] sm:$0xff]  ;;  %v4528_v40 = vld [vmem:[%s5031_s4] ss:$0 sm:$0xff]  ;;  %v705_v46 = vld [vmem:[%s5035_s8 + $0x10] sm:$0xff]  ;;  %s4188_s22 = smov 120   ;;  %vm1034_vm2 = vcmask 64512  }
  0x8b   : > { %3575 = vmatprep.mubr.msk.f32.mxu0 %vm4186_vm1, %v4187_v23  ;;  %v4531_v43 = vpack.c.bf16 %v704_v39, %v703_v38  ;;  %v706_v47 = vld [vmem:[%s5035_s8 + $0x18] sm:$0xff]  ;;  %v707_v50 = vld [vmem:[%s5036_s9] sm:$0xff]  ;;  %v708_v51 = vld [vmem:[%s5036_s9 + $0x8] sm:$0xff]  ;;  %s4189_s3 = smov 112   ;;  %s4190_s19 = smov 104   ;;  %vm1372_vm3 = vcmask 130112  }
  0x8c   : > { %3792 = vmatpush3.bf16.msra.mxu1 %v4493_v18  ;;  %v4545_v48 = vpack.c.bf16 %v706_v47, %v705_v46  ;;  %v4558_v52 = vpack.c.bf16 %v708_v51, %v707_v50  ;;  %v709_v54 = vld [vmem:[%s5036_s9 + $0x10] sm:$0xff]  ;;  %v710_v55 = vld [vmem:[%s5036_s9 + $0x18] sm:$0xff]  ;;  %s4191_s24 = smov 8   ;;  %s4192_s6 = smov 16   ;;  %vm1546_vm4 = vcmask 195712   ;;  %vm1720_vm5 = vcmask 261312  }
  0x8d   : > { %768 = vadd.xlane.f32.xlu0 %v767_v3  ;;  %3793 = vmatprep.subr.bf16.mxu1 %v4185_v19  ;;  %v4573_v56 = vpack.c.bf16 %v710_v55, %v709_v54  ;;  %s4193_s0 = smov 24   ;;  %s5104_s29 = sld [smem:[#allocation26_spill]] }
  0x8e   : > { %s5105_s16 = sld [smem:[#allocation24_spill]]  ;;  %s5106_s5 = sld [smem:[#allocation25_spill]] }
  0x8f   : > { %v4517_v36 = vld [vmem:[%s5103_s27] ss:$0 sm:$0xff]  ;;  %s5107_s20 = sld [smem:[#allocation28_spill]]  ;;  %s5112_s25 = sld [smem:[#allocation30_spill]] }
  0x90   : > { %3795 = vmatpush3.bf16.msra.mxu1 %v4504_v22 }
  0x91   : > { %783 = vadd.xlane.f32.xlu0 %v782_v5  ;;  %3796 = vmatprep.subr.bf16.mxu1 %v4185_v19 }
  0x95   : > { %s5108_s28 = smov %s5107_s20 }
 0x116   : > { %v741_v6 = vpop.xlane.xlu0 %740 }
 0x117   : > { %v743_v7 = vmul.f32 0.03125, %v741_v6 }
 0x119   : > { %v744_v8 = vsub.f32 %v735_v0, %v743_v7  ;;  %v4591_v0 = vld [vmem:[%s5037_s10] ss:$0 sm:$0xff] }
 0x11a   : > { %v769_v9 = vpop.xlane.xlu0 %768 }
 0x11b   : > { %v770_v10 = vmul.f32 0.03125, %v769_v9  ;;  %v745_v11 = vmul.f32 %v744_v8, %v744_v8 }
 0x11d   : > { %v771_v12 = vsub.f32 %v736_v1, %v770_v10  ;;  %v746_v13 = vsel %vm738_vm0, %v745_v11, 0.0 }
 0x11e   : > { %747 = vadd.xlane.f32.xlu1 %v746_v13  ;;  %v784_v24 = vpop.xlane.xlu0 %783 }
 0x11f   : > { %v772_v14 = vmul.f32 %v771_v12, %v771_v12  ;;  %v785_v25 = vmul.f32 0.03125, %v784_v24 }
 0x121   : > { %v773_v15 = vsel %vm738_vm0, %v772_v14, 0.0  ;;  %v786_v26 = vsub.f32 %v737_v4, %v785_v25  ;;  %v4598_v4 = vld [vmem:[%s5038_s11] ss:$0 sm:$0xff] }
 0x122   : > { %774 = vadd.xlane.f32.xlu1 %v773_v15 }
 0x123   : > { %v787_v27 = vmul.f32 %v786_v26, %v786_v26 }
 0x125   : > { %v788_v28 = vsel %vm738_vm0, %v787_v27, 0.0 }
 0x126   : > { %789 = vadd.xlane.f32.xlu1 %v788_v28 }
 0x1ab   : > { %v748_v29 = vpop.xlane.xlu1 %747 }
 0x1ac   : > { %v749_v30 = vmul.f32 0.03125, %v748_v29 }
 0x1ae   : > { %v750_v31 = vadd.f32 1e-05, %v749_v30 }
 0x1af   : > { %v775_v32 = vpop.xlane.xlu1 %774 }
 0x1b0   : > { %3964 = vrsqrt.f32 %v750_v31  ;;  %v776_v33 = vmul.f32 0.03125, %v775_v32 }
 0x1b2   : > { %v777_v34 = vadd.f32 1e-05, %v776_v33 }
 0x1b3   : > { %v790_v57 = vpop.xlane.xlu1 %789 }
 0x1b4   : > { %3966 = vrsqrt.f32 %v777_v34  ;;  %v791_v58 = vmul.f32 0.03125, %v790_v57 }
 0x1b6   : > { %v792_v59 = vadd.f32 1e-05, %v791_v58 }
 0x1b8   : > { %3968 = vrsqrt.f32 %v792_v59 }
 0x1ba   : > { %v3965_v35 = vpop.eup %3964 }
 0x1bb   : > { %v752_v37 = vmul.f32 %v3965_v35, %v744_v8  ;;  %v4614_v8 = vld [vmem:[%s5039_s12] ss:$0 sm:$0xff] }
 0x1bd   : > { %v759_v41 = vmul.f32 %v4517_v36, %v752_v37 }
 0x1be   : > { %v3967_v42 = vpop.eup %3966 }
 0x1bf   : > { %v779_v44 = vmul.f32 %v3967_v42, %v771_v12  ;;  %v4534_v45 = vadd.f32 %v4528_v40, %v759_v41 }
 0x1c1   : > { %3539 = vmatmul.mubr.msk.f32.vlgmr.msra.gmra.mrb[0].mxu1 %vm738_vm0, %v4534_v45  ;;  %v780_v49 = vmul.f32 %v4517_v36, %v779_v44 }
 0x1c2   : > { %3798 = vmatpush3.bf16.msra.mxu1 %v4531_v43  ;;  %3549 = vmatprep.mubr.msk.f32.mxu1 %vm4186_vm1, %v4187_v23  ;;  %v3969_v60 = vpop.eup %3968 }
 0x1c3   : > { %3799 = vmatprep.subr.bf16.mxu1 %v4185_v19  ;;  %v4561_v53 = vadd.f32 %v4528_v40, %v780_v49  ;;  %v794_v61 = vmul.f32 %v3969_v60, %v786_v26 }
 0x1c5   : > { %v795_v62 = vmul.f32 %v4517_v36, %v794_v61 }
 0x1c6   : > { %3801 = vmatpush3.bf16.msra.mxu1 %v4545_v48 }
 0x1c7   : > { %3802 = vmatprep.subr.bf16.mxu1 %v4185_v19  ;;  %v4582_v63 = vadd.f32 %v4528_v40, %v795_v62 }
 0x1c9   : > { %3550 = vmatmul.mubr.msk.f32.vlgmr.msra.gmra.mrb[2].mxu1 %vm738_vm0, %v4561_v53 }
 0x1ca   : > { %3804 = vmatpush3.bf16.msra.mxu1 %v4558_v52  ;;  %3560 = vmatprep.mubr.msk.f32.mxu1 %vm4186_vm1, %v4187_v23 }
 0x1cb   : > { %3805 = vmatprep.subr.bf16.mxu1 %v4185_v19 }
 0x1ce   : > { %3807 = vmatpush3.bf16.msra.mxu1 %v4573_v56 }
 0x1cf   : > { %3563 = vmatprep.subr.mxu1 %v4187_v23 }
 0x1d1   : > { %3561 = vmatmul.mubr.msk.f32.vlgmr.msra.gmra.mrb[4].mxu1 %vm738_vm0, %v4582_v63 }
 0x1d2   : > { %3565 = vmatprep.mubr.msk.f32.mxu1 %vm4186_vm1, %v4187_v23 }
 0x294   : > { %v872_v1 = vpop.f32.mrb[0].mxu1 }
 0x295   : > { %v873_v2 = vadd.f32 %v4591_v0, %v872_v1  ;;  %v3540_v3 = vpop.f32.mrb[1].mxu1 }
 0x297   : > { %1199 = vrot.lane.b32.xlu1 %v873_v2, %s4188_s22 }
 0x29c   : > { %v951_v5 = vpop.f32.mrb[2].mxu1 }
 0x29d   : > { %v952_v6 = vadd.f32 %v4598_v4, %v951_v5  ;;  %v3551_v7 = vpop.f32.mrb[3].mxu1 }
 0x29f   : > { %1376 = vrot.lane.b32.xlu1 %v952_v6, %s4189_s3  ;;  %1201 = vrot.lane.b32.xlu0 %v952_v6, %s4188_s22 }
 0x2a0   : > { %3564 = vmatpush3.xpose.msk.msra.mxu1 %vm1034_vm2, %v952_v6 }
 0x2a1   : > { %3568 = vmatprep.subr.mxu1 %v4187_v23 }
 0x2a3   : > { %3566 = vmatmul.mubr.msk.f32.vlgmr.msra.gmra.mrb[6].mxu1 %vm1034_vm2, %v873_v2  ;;  %1374 = vrot.lane.b32.xlu1 %v873_v2, %s4189_s3 }
 0x2a4   : > { %1550 = vrot.lane.b32.xlu0 %v952_v6, %s4190_s19  ;;  %3570 = vmatprep.mubr.msk.f32.mxu1 %vm4186_vm1, %v4187_v23  ;;  %v1030_v9 = vpop.f32.mrb[4].mxu1 }
 0x2a5   : > { %v4617_v10 = vadd.f32 %v4614_v8, %v1030_v9  ;;  %v3562_v11 = vpop.f32.mrb[5].mxu1 }
 0x2a7   : > { %1548 = vrot.lane.b32.xlu1 %v873_v2, %s4190_s19  ;;  %3569 = vmatpush3.msra.mxu1 %v4617_v10 }
 0x2a8   : > { %3578 = vmatprep.subr.mxu1 %v4187_v23 }
 0x309   : > { %v1200_v12 = vpop.permute.xlu1 %1199 }
 0x311   : > { %v1377_v13 = vpop.permute.xlu1 %1376  ;;  %v1202_v14 = vpop.permute.xlu0 %1201 }
 0x312   : > { %3574 = vmatpush3.xpose.msk.msra.mxu0 %vm1034_vm2, %v1202_v14 }
 0x313   : > { %3583 = vmatprep.subr.mxu0 %v4187_v23 }
 0x315   : > { %3576 = vmatmul.mubr.msk.f32.vlgmr.msra.gmra.mrb[0].mxu0 %vm1034_vm2, %v1200_v12  ;;  %v1375_v15 = vpop.permute.xlu1 %1374 }
 0x316   : > { %3584 = vmatpush3.xpose.msk.msra.mxu0 %vm1034_vm2, %v1377_v13  ;;  %3585 = vmatprep.mubr.msk.f32.mxu0 %vm4186_vm1, %v4187_v23  ;;  %v1551_v16 = vpop.permute.xlu0 %1550 }
 0x317   : > { %3593 = vmatprep.subr.mxu0 %v4187_v23 }
 0x319   : > { %3586 = vmatmul.mubr.msk.f32.vlgmr.msra.gmra.mrb[2].mxu0 %vm1034_vm2, %v1375_v15  ;;  %v1549_v17 = vpop.permute.xlu1 %1548 }
 0x31a   : > { %3594 = vmatpush3.xpose.msk.msra.mxu0 %vm1034_vm2, %v1551_v16  ;;  %3595 = vmatprep.mubr.msk.f32.mxu0 %vm4186_vm1, %v4187_v23 }
 0x31b   : > { %3808 = vmatprep.subr.bf16.mxu0 %v4185_v19 }
 0x31d   : > { %3596 = vmatmul.mubr.msk.f32.vlgmr.msra.gmra.mrb[4].mxu0 %vm1034_vm2, %v1549_v17 }
 0x31e   : > { %3611 = vmatprep.mubr.msk.f32.mxu0 %vm4186_vm1, %v4187_v23 }
 0x376   : > { %v1107_v20 = vpop.f32.mrb[6].mxu1 }
 0x377   : > { %v3567_v21 = vpop.f32.mrb[7].mxu1  ;;  %v1111_v24 = vsel %vm1034_vm2, %v1107_v20, -inf }
 0x378   : > { %1112 = vmax.xlane.f32.xlu0 %v1111_v24 }
 0x3e8   : > { %v1273_v25 = vpop.f32.mrb[0].mxu0 }
 0x3e9   : > { %v3577_v26 = vpop.f32.mrb[1].mxu0  ;;  %v1277_v27 = vsel %vm1034_vm2, %v1273_v25, -inf }
 0x3ea   : > { %1278 = vmax.xlane.f32.xlu1 %v1277_v27 }
 0x3ec   : > { %v1448_v28 = vpop.f32.mrb[2].mxu0 }
 0x3ed   : > { %v3587_v29 = vpop.f32.mrb[3].mxu0  ;;  %v1452_v30 = vsel %vm1034_vm2, %v1448_v28, -inf }
 0x3ee   : > { %1453 = vmax.xlane.f32.xlu0 %v1452_v30 }
 0x3f0   : > { %v1622_v31 = vpop.f32.mrb[4].mxu0 }
 0x3f1   : > { %v3597_v32 = vpop.f32.mrb[5].mxu0  ;;  %v1626_v33 = vsel %vm1034_vm2, %v1622_v31, -inf }
 0x3f2   : > { %1627 = vmax.xlane.f32.xlu0 %v1626_v33 }
 0x405   : > { %v1113_v34 = vpop.xlane.xlu0 %1112 }
 0x406   : > { %v1114_v35 = vsub.f32 %v1107_v20, %v1113_v34 }
 0x408   : > { %v1115_v37 = vmul.f32 1.442695, %v1114_v35 }
 0x40a   : > { %3970 = vpow2.f32 %v1115_v37 }
 0x414   : > { %v3971_v38 = vpop.eup %3970 }
 0x415   : > { %v1117_v39 = vsel %vm1034_vm2, %v3971_v38, 0.0 }
 0x416   : > { %1118 = vadd.xlane.f32.xlu0 %v1117_v39 }
 0x477   : > { %v1279_v41 = vpop.xlane.xlu1 %1278 }
 0x478   : > { %v1280_v42 = vsub.f32 %v1273_v25, %v1279_v41  ;;  %v711_v41 = vld [vmem:[%s5040_s13] sm:$0xff] }
 0x47a   : > { %v1281_v44 = vmul.f32 1.442695, %v1280_v42  ;;  %v712_v42 = vld [vmem:[%s5040_s13 + $0x8] sm:$0xff] }
 0x47b   : > { %v1454_v46 = vpop.xlane.xlu0 %1453 }
 0x47c   : > { %3972 = vpow2.f32 %v1281_v44  ;;  %v1455_v47 = vsub.f32 %v1448_v28, %v1454_v46  ;;  %v4674_v44 = vpack.c.bf16 %v712_v42, %v711_v41  ;;  %v713_v46 = vld [vmem:[%s5040_s13 + $0x10] sm:$0xff]  ;;  %v728_v41 = vld [vmem:[%s5108_s28 + $0x48] sm:$0xff] }
 0x47e   : > { %v1456_v49 = vmul.f32 1.442695, %v1455_v47  ;;  %v714_v47 = vld [vmem:[%s5040_s13 + $0x18] sm:$0xff]  ;;  %3810 = vmatpush3.bf16.msra.mxu0 %v4674_v44 }
 0x47f   : > { %v1628_v57 = vpop.xlane.xlu0 %1627  ;;  %3811 = vmatprep.subr.bf16.mxu0 %v4185_v19 }
 0x480   : > { %3974 = vpow2.f32 %v1456_v49  ;;  %v1629_v59 = vsub.f32 %v1622_v31, %v1628_v57  ;;  %v4683_v49 = vpack.c.bf16 %v714_v47, %v713_v46  ;;  %v729_v46 = vld [vmem:[%s5108_s28 + $0x50] sm:$0xff]  ;;  %v730_v47 = vld [vmem:[%s5108_s28 + $0x58] sm:$0xff] }
 0x482   : > { %v1630_v60 = vmul.f32 1.442695, %v1629_v59  ;;  %3813 = vmatpush3.bf16.msra.mxu0 %v4683_v49  ;;  %v4698_v59 = vld [vmem:[%s5041_s14] ss:$0 sm:$0xff] }
 0x483   : > { %3820 = vmatprep.subr.bf16.mxu0 %v4185_v19 }
 0x486   : > { %v3973_v50 = vpop.eup %3972 }
 0x487   : > { %v1283_v51 = vsel %vm1034_vm2, %v3973_v50, 0.0 }
 0x488   : > { %1284 = vadd.xlane.f32.xlu1 %v1283_v51 }
 0x48a   : > { %v3975_v54 = vpop.eup %3974 }
 0x48b   : > { %v1458_v55 = vsel %vm1034_vm2, %v3975_v54, 0.0 }
 0x48c   : > { %1459 = vadd.xlane.f32.xlu0 %v1458_v55 }
 0x499   : > { %1466 = vrot.lane.b32.xlu1 %v4617_v10, %s4189_s3 }
 0x4a2   : > { %1292 = vrot.lane.b32.xlu0 %v4617_v10, %s4188_s22 }
 0x4a3   : > { %v1119_v58 = vpop.xlane.xlu0 %1118 }
 0x4a4   : > { %3976 = vrcp.f32 %v1119_v58 }
 0x4a5   : > { %3978 = vpow2.f32 %v1630_v60 }
 0x4ae   : > { %v3977_v61 = vpop.eup %3976 }
 0x4af   : > { %v1121_v62 = vmul.f32 %v3977_v61, %v1119_v58  ;;  %v3979_v5 = vpop.eup %3978 }
 0x4b0   : > { %v1632_v6 = vsel %vm1034_vm2, %v3979_v5, 0.0 }
 0x4b1   : > { %v1122_v1 = vsub.f32 2.0, %v1121_v62 }
 0x4b3   : > { %v1123_v2 = vmul.f32 %v3977_v61, %v1122_v1 }
 0x4b5   : > { %v1124_v3 = vmul.f32 %v3971_v38, %v1123_v2 }
 0x4b7   : > { %3571 = vmatmul.mubr.msk.f32.vlgmr.msra.gmra.mrb[8].mxu1 %vm1034_vm2, %v1124_v3 }
 0x4b8   : > { %3580 = vmatprep.mubr.msk.f32.mxu1 %vm4186_vm1, %v4187_v23 }
 0x4bd   : > { %1633 = vadd.xlane.f32.xlu1 %v1632_v6 }
 0x4ce   : > { %1640 = vrot.lane.b32.xlu1 %v4617_v10, %s4190_s19 }
 0x515   : > { %v1285_v7 = vpop.xlane.xlu1 %1284 }
 0x516   : > { %3980 = vrcp.f32 %v1285_v7 }
 0x519   : > { %v1460_v9 = vpop.xlane.xlu0 %1459  ;;  %v1467_v24 = vpop.permute.xlu1 %1466 }
 0x51a   : > { %3982 = vrcp.f32 %v1460_v9 }
 0x51d   : > { %v1293_v11 = vpop.permute.xlu0 %1292 }
 0x51e   : > { %3579 = vmatpush3.msra.mxu1 %v1293_v11  ;;  %v715_v11 = vld [vmem:[%s5104_s29] sm:$0xff] }
 0x51f   : > { %3588 = vmatprep.subr.mxu1 %v4187_v23 }
 0x520   : > { %v3981_v12 = vpop.eup %3980 }
 0x521   : > { %v1287_v13 = vmul.f32 %v3981_v12, %v1285_v7 }
 0x523   : > { %v1288_v14 = vsub.f32 2.0, %v1287_v13  ;;  %v717_v13 = vld [vmem:[%s5104_s29 + $0x10] sm:$0xff] }
 0x524   : > { %v3983_v15 = vpop.eup %3982 }
 0x525   : > { %v1289_v16 = vmul.f32 %v3981_v12, %v1288_v14  ;;  %v1462_v17 = vmul.f32 %v3983_v15, %v1460_v9  ;;  %v718_v14 = vld [vmem:[%s5104_s29 + $0x18] sm:$0xff] }
 0x527   : > { %v1290_v20 = vmul.f32 %v3973_v50, %v1289_v16  ;;  %v1463_v21 = vsub.f32 2.0, %v1462_v17 }
 0x529   : > { %v1464_v25 = vmul.f32 %v3983_v15, %v1463_v21  ;;  %3581 = vmatmul.mubr.msk.f32.vlgmr.msra.gmra.mrb[10].mxu1 %vm1034_vm2, %v1290_v20  ;;  %v4724_v15 = vpack.c.bf16 %v718_v14, %v717_v13 }
 0x52a   : > { %3589 = vmatpush3.msra.mxu1 %v1467_v24  ;;  %3590 = vmatprep.mubr.msk.f32.mxu1 %vm4186_vm1, %v4187_v23  ;;  %v4731_v24 = vld [vmem:[%s5105_s16] ss:$0 sm:$0xff]  ;;  %s3226_s16 = scalar_lea.sflag [#allocation5], %s4464_s17 }
 0x52b   : > { %v1465_v10 = vmul.f32 %v3975_v54, %v1464_v25  ;;  %3598 = vmatprep.subr.mxu1 %v4187_v23 }
 0x52d   : > { %3591 = vmatmul.mubr.msk.f32.vlgmr.msra.gmra.mrb[12].mxu1 %vm1034_vm2, %v1465_v10  ;;  %v4736_v10 = vld [vmem:[%s5106_s5] ss:$0 sm:$0xff]  ;;  %s5109_s5 = sld [smem:[#allocation27_spill]] }
 0x52e   : > { %3600 = vmatprep.mubr.msk.f32.mxu1 %vm4186_vm1, %v4187_v23 }
 0x54a   : > { %v1634_v26 = vpop.xlane.xlu1 %1633 }
 0x54b   : > { %3984 = vrcp.f32 %v1634_v26 }
 0x54e   : > { %v1641_v27 = vpop.permute.xlu1 %1640 }
 0x54f   : > { %3599 = vmatpush3.msra.mxu1 %v1641_v27 }
 0x550   : > { %3814 = vmatprep.subr.bf16.mxu1 %v4185_v19 }
 0x555   : > { %v3985_v28 = vpop.eup %3984 }
 0x556   : > { %v1636_v29 = vmul.f32 %v3985_v28, %v1634_v26 }
 0x558   : > { %v1637_v30 = vsub.f32 2.0, %v1636_v29  ;;  %v720_v29 = vld [vmem:[%s5108_s28 + $0x8] sm:$0xff] }
 0x55a   : > { %v1638_v31 = vmul.f32 %v3985_v28, %v1637_v30  ;;  %v719_v28 = vld [vmem:[%s5107_s20] sm:$0xff]  ;;  %s5110_s20 = sld [smem:[#allocation29_spill]] }
 0x55b   : > { %v4753_v30 = vpack.c.bf16 %v720_v29, %v719_v28 }
 0x55c   : > { %v1639_v32 = vmul.f32 %v3979_v5, %v1638_v31 }
 0x55e   : > { %3601 = vmatmul.mubr.msk.f32.vlgmr.msra.gmra.mrb[14].mxu1 %vm1034_vm2, %v1639_v32  ;;  %v723_v32 = vld [vmem:[%s5108_s28 + $0x20] sm:$0xff] }
 0x55f   : > { %3622 = vmatprep.mubr.msk.f32.mxu1 %vm4186_vm1, %v4187_v23 }
 0x58a   : > { %v1194_v33 = vpop.f32.mrb[8].mxu1 }
 0x58b   : > { %1198 = vst.msk [vmem:[#allocation2] sm:$0xff] %vm1034_vm2, %v1194_v33  ;;  %v3572_v34 = vpop.f32.mrb[9].mxu1  ;;  %v724_v33 = vld [vmem:[%s5108_s28 + $0x28] sm:$0xff] }
 0x58c   : > { %v4773_v34 = vpack.c.bf16 %v724_v33, %v723_v32  ;;  %v4194_v33 = vmov -1.0  }
 0x5fc   : > { %v1364_v35 = vpop.f32.mrb[10].mxu1 }
 0x5fd   : > { %1369 = vrot.lane.b32.xlu1 %v1364_v35, %s4191_s24  ;;  %v3582_v37 = vpop.f32.mrb[11].mxu1  ;;  %v725_v35 = vld [vmem:[%s5108_s28 + $0x30] sm:$0xff] }
 0x5fe   : > { %v726_v37 = vld [vmem:[%s5108_s28 + $0x38] sm:$0xff] }
 0x600   : > { %v1538_v38 = vpop.f32.mrb[12].mxu1 }
 0x601   : > { %1543 = vrot.lane.b32.xlu0 %v1538_v38, %s4192_s6  ;;  %v3592_v39 = vpop.f32.mrb[13].mxu1  ;;  %v4783_v38 = vpack.c.bf16 %v726_v37, %v725_v35 }
 0x602   : > { %v727_v39 = vld [vmem:[%s5108_s28 + $0x40] sm:$0xff] }
 0x603   : > { %v4793_v42 = vpack.c.bf16 %v728_v41, %v727_v39 }
 0x631   : > { %v1712_v50 = vpop.f32.mrb[14].mxu1 }
 0x632   : > { %1717 = vrot.lane.b32.xlu1 %v1712_v50, %s4193_s0  ;;  %v3602_v51 = vpop.f32.mrb[15].mxu1  ;;  %v4803_v50 = vpack.c.bf16 %v730_v47, %v729_v46 }
 0x633   : > { %v731_v51 = vld [vmem:[%s5108_s28 + $0x60] sm:$0xff] }
 0x66f   : > { %v1370_v54 = vpop.permute.xlu1 %1369 }
 0x670   : > { %1373 = vst.msk [vmem:[#allocation2] sm:$0xff] %vm1372_vm3, %v1370_v54  ;;  %v732_v54 = vld [vmem:[%s5108_s28 + $0x68] sm:$0xff] }
 0x673   : > { %v1544_v55 = vpop.permute.xlu0 %1543 }
 0x674   : > { %1547 = vst.msk [vmem:[#allocation2] sm:$0xff] %vm1546_vm4, %v1544_v55  ;;  %v4813_v55 = vpack.c.bf16 %v732_v54, %v731_v51  ;;  %v4839_v51 = vld [vmem:[%s5110_s20] ss:$0 sm:$0xff] }
 0x6a4   : > { %v1718_v57 = vpop.permute.xlu1 %1717 }
 0x6a5   : > { %1721 = vst.msk [vmem:[#allocation2] sm:$0xff] %vm1720_vm5, %v1718_v57  ;;  %v733_v57 = vld [vmem:[%s5108_s28 + $0x70] sm:$0xff] }
 0x6ac   : > { %v1722_v58 = vld [vmem:[#allocation2] sm:$0xff] }
 0x6ad   : > { %3612 = vmatmul.mubr.msk.f32.vlgmr.msra.gmra.mrb[6].mxu0 %vm738_vm0, %v1722_v58  ;;  %v734_v58 = vld [vmem:[%s5108_s28 + $0x78] sm:$0xff] }
 0x6ae   : > { %3657 = vmatprep.mubr.msk.f32.mxu0 %vm4186_vm1, %v4187_v23  ;;  %3822 = vmatpush3.bf16.msra.mxu0 %v4753_v30 }
 0x6af   : > { %3823 = vmatprep.subr.bf16.mxu0 %v4185_v19 }
 0x780   : > { %v1798_v60 = vpop.f32.mrb[6].mxu0 }
 0x781   : > { %v1799_v61 = vadd.f32 %v4698_v59, %v1798_v60  ;;  %v3613_v62 = vpop.f32.mrb[7].mxu0  ;;  %v4823_v60 = vpack.c.bf16 %v734_v58, %v733_v57 }
 0x783   : > { %v4702_v1 = vadd.f32 %v1799_v61, %v4534_v45  ;;  %v716_v45 = vld [vmem:[%s5104_s29 + $0x8] sm:$0xff]  ;;  %v4830_v61 = vld [vmem:[%s5109_s5] ss:$0 sm:$0xff] }
 0x784   : > { %v4714_v12 = vpack.c.bf16 %v716_v45, %v715_v11 }
 0x785   : > { %v1803_v2 = vsel %vm738_vm0, %v4702_v1, 0.0 }
 0x786   : > { %1804 = vadd.xlane.f32.xlu0 %v1803_v2  ;;  %3816 = vmatpush3.bf16.msra.mxu1 %v4714_v12 }
 0x787   : > { %3817 = vmatprep.subr.bf16.mxu1 %v4185_v19 }
 0x78a   : > { %3819 = vmatpush3.bf16.msra.mxu1 %v4724_v15 }
 0x78b   : > { %3844 = vmatprep.subr.bf16.mxu1 %v4185_v19 }
 0x813   : > { %v1805_v3 = vpop.xlane.xlu0 %1804 }
 0x814   : > { %v1806_v5 = vmul.f32 0.03125, %v1805_v3 }
 0x816   : > { %v1807_v6 = vsub.f32 %v4702_v1, %v1806_v5 }
 0x818   : > { %v1808_v7 = vmul.f32 %v1807_v6, %v1807_v6 }
 0x81a   : > { %v1809_v9 = vsel %vm738_vm0, %v1808_v7, 0.0 }
 0x81b   : > { %1810 = vadd.xlane.f32.xlu1 %v1809_v9 }
 0x8a8   : > { %v1811_v16 = vpop.xlane.xlu1 %1810 }
 0x8a9   : > { %v1812_v17 = vmul.f32 0.03125, %v1811_v16 }
 0x8ab   : > { %v1813_v20 = vadd.f32 1e-05, %v1812_v17 }
 0x8ad   : > { %3986 = vrsqrt.f32 %v1813_v20 }
 0x8b7   : > { %v3987_v21 = vpop.eup %3986 }
 0x8b8   : > { %v1815_v25 = vmul.f32 %v3987_v21, %v1807_v6 }
 0x8ba   : > { %v1822_v26 = vmul.f32 %v4731_v24, %v1815_v25 }
 0x8bc   : > { %v1829_v27 = vadd.f32 %v4736_v10, %v1822_v26 }
 0x8be   : > { %3623 = vmatmul.mubr.msk.f32.vlgmr.msra.gmra.mrb[16].mxu1 %vm738_vm0, %v1829_v27 }
 0x8bf   : > { %3846 = vmatpush3.bf16.msra.mxu1 %v4493_v18  ;;  %3668 = vmatprep.mubr.msk.f32.mxu1 %vm4186_vm1, %v4187_v23  ;;  %v721_v18 = vld [vmem:[%s5108_s28 + $0x10] sm:$0xff] }
 0x8c0   : > { %3847 = vmatprep.subr.bf16.mxu1 %v4185_v19 }
 0x8c3   : > { %3849 = vmatpush3.bf16.msra.mxu1 %v4504_v22  ;;  %v722_v22 = vld [vmem:[%s5108_s28 + $0x18] sm:$0xff] }
 0x8c4   : > { %3850 = vmatprep.subr.bf16.mxu1 %v4185_v19  ;;  %v4763_v31 = vpack.c.bf16 %v722_v22, %v721_v18 }
 0x8c6   : > { %3825 = vmatpush3.bf16.msra.mxu0 %v4763_v31 }
 0x8c7   : > { %3826 = vmatprep.subr.bf16.mxu0 %v4185_v19 }
 0x8ca   : > { %3828 = vmatpush3.bf16.msra.mxu0 %v4773_v34 }
 0x8cb   : > { %3829 = vmatprep.subr.bf16.mxu0 %v4185_v19 }
 0x8ce   : > { %3831 = vmatpush3.bf16.msra.mxu0 %v4783_v38 }
 0x8cf   : > { %3832 = vmatprep.subr.bf16.mxu0 %v4185_v19 }
 0x8d2   : > { %3834 = vmatpush3.bf16.msra.mxu0 %v4793_v42 }
 0x8d3   : > { %3835 = vmatprep.subr.bf16.mxu0 %v4185_v19 }
 0x8d6   : > { %3837 = vmatpush3.bf16.msra.mxu0 %v4803_v50 }
 0x8d7   : > { %3838 = vmatprep.subr.bf16.mxu0 %v4185_v19 }
 0x8da   : > { %3840 = vmatpush3.bf16.msra.mxu0 %v4813_v55 }
 0x8db   : > { %3841 = vmatprep.subr.bf16.mxu0 %v4185_v19 }
 0x8de   : > { %3843 = vmatpush3.bf16.msra.mxu0 %v4823_v60 }
 0x8df   : > { %3703 = vmatprep.subr.mxu0 %v4187_v23 }
 0x991   : > { %v1905_v62 = vpop.f32.mrb[16].mxu1 }
 0x992   : > { %v1906_v2 = vadd.f32 %v4830_v61, %v1905_v62  ;;  %v3624_v3 = vpop.f32.mrb[17].mxu1 }
 0x994   : > { %v1910_v5 = vmul.f32 0.70710677, %v1906_v2  ;;  %v1909_v39 = vmul.f32 0.5, %v1906_v2  ;;  %v2029_v2 = vsel %vm738_vm0, %v4561_v53, 0.0 }
 0x996   : > { %v1913_v6 = vand.u32 2147483647, %v1910_v5  ;;  %vm1911_vm6 = vcmp.ge.f32.partialorder %v1910_v5, 0.0 }
 0x997   : > { %v1912_v35 = vsel %vm1911_vm6, 1.0, %v4194_v33 }
 0x998   : > { %v1914_v7 = vmul.f32 0.3275911, %v1913_v6  ;;  %v1927_v11 = vsub.f32 0.0, %v1913_v6 }
 0x99a   : > { %v1915_v9 = vadd.f32 1.0, %v1914_v7  ;;  %v1928_v13 = vmul.f32 %v1927_v11, %v1913_v6 }
 0x99c   : > { %3988 = vrcp.f32 %v1915_v9  ;;  %v1929_v17 = vmul.f32 1.442695, %v1928_v13 }
 0x99e   : > { %3990 = vpow2.f32 %v1929_v17 }
 0x9a6   : > { %v3989_v45 = vpop.eup %3988 }
 0x9a7   : > { %v1918_v14 = vmul.f32 1.0614054, %v3989_v45 }
 0x9a8   : > { %v3991_v18 = vpop.eup %3990 }
 0x9a9   : > { %v1919_v16 = vadd.f32 -1.4531521, %v1918_v14  ;;  %v2044_v14 = vsel %vm738_vm0, %v4582_v63, 0.0 }
 0x9ab   : > { %v1920_v20 = vmul.f32 %v3989_v45, %v1919_v16 }
 0x9ad   : > { %v1921_v21 = vadd.f32 1.4214138, %v1920_v20 }
 0x9af   : > { %v1922_v25 = vmul.f32 %v3989_v45, %v1921_v21 }
 0x9b1   : > { %v1923_v26 = vadd.f32 -0.28449672, %v1922_v25 }
 0x9b3   : > { %v1924_v27 = vmul.f32 %v3989_v45, %v1923_v26 }
 0x9b5   : > { %v1925_v28 = vadd.f32 0.2548296, %v1924_v27 }
 0x9b7   : > { %v1926_v29 = vmul.f32 %v3989_v45, %v1925_v28 }
 0x9b9   : > { %v1931_v22 = vmul.f32 %v3991_v18, %v1926_v29 }
 0x9bb   : > { %v1932_v32 = vsub.f32 1.0, %v1931_v22 }
 0x9bd   : > { %v1933_v37 = vmul.f32 %v1932_v32, %v1912_v35 }
 0x9bf   : > { %v1934_v41 = vadd.f32 1.0, %v1933_v37 }
 0x9c1   : > { %v1935_v46 = vmul.f32 %v1934_v41, %v1909_v39 }
 0x9c3   : > { %3658 = vmatmul.mubr.f32.vlgmr.msra.gmra.mrb[8].mxu0 %v1935_v46 }
 0x9c4   : > { %3705 = vmatprep.mubr.msk.f32.mxu0 %vm4186_vm1, %v4187_v23 }
 0xa96   : > { %v2002_v47 = vpop.f32.mrb[8].mxu0 }
 0xa97   : > { %v2006_v54 = vadd.f32 %v2002_v47, %v4702_v1  ;;  %v3659_v57 = vpop.f32.mrb[9].mxu0 }
 0xa99   : > { %v2013_v58 = vadd.f32 %v4839_v51, %v2006_v54 }
 0xa9b   : > { %v2014_v62 = vsel %vm738_vm0, %v2013_v58, 0.0 }
 0xa9c   : > { %2015 = vadd.xlane.f32.xlu0 %v2014_v62 }
 0xaa0   : > { %2030 = vadd.xlane.f32.xlu0 %v2029_v2 }
 0xb29   : > { %v2016_v3 = vpop.xlane.xlu0 %2015 }
 0xb2a   : > { %v2017_v5 = vmul.f32 0.03125, %v2016_v3 }
 0xb2c   : > { %v2018_v6 = vsub.f32 %v2013_v58, %v2017_v5 }
 0xb2d   : > { %v2031_v7 = vpop.xlane.xlu0 %2030 }
 0xb2e   : > { %v2032_v9 = vmul.f32 0.03125, %v2031_v7  ;;  %v2019_v11 = vmul.f32 %v2018_v6, %v2018_v6 }
 0xb30   : > { %v2033_v45 = vsub.f32 %v4561_v53, %v2032_v9  ;;  %v2020_v1 = vsel %vm738_vm0, %v2019_v11, 0.0 }
 0xb31   : > { %2021 = vadd.xlane.f32.xlu0 %v2020_v1 }
 0xb32   : > { %v2034_v13 = vmul.f32 %v2033_v45, %v2033_v45 }
 0xb34   : > { %v2035_v16 = vsel %vm738_vm0, %v2034_v13, 0.0 }
 0xb35   : > { %2045 = vadd.xlane.f32.xlu0 %v2044_v14  ;;  %2036 = vadd.xlane.f32.xlu1 %v2035_v16 }
 0xbbe   : > { %v2022_v17 = vpop.xlane.xlu0 %2021 }
 0xbbf   : > { %v2023_v20 = vmul.f32 0.03125, %v2022_v17 }
 0xbc1   : > { %v2024_v21 = vadd.f32 1e-05, %v2023_v20 }
 0xbc2   : > { %v2037_v25 = vpop.xlane.xlu1 %2036  ;;  %v2046_v26 = vpop.xlane.xlu0 %2045 }
 0xbc3   : > { %3992 = vrsqrt.f32 %v2024_v21  ;;  %v2038_v27 = vmul.f32 0.03125, %v2037_v25  ;;  %v2047_v28 = vmul.f32 0.03125, %v2046_v26 }
 0xbc5   : > { %v2039_v53 = vadd.f32 1e-05, %v2038_v27  ;;  %v2048_v29 = vsub.f32 %v4582_v63, %v2047_v28 }
 0xbc7   : > { %3994 = vrsqrt.f32 %v2039_v53  ;;  %v2049_v18 = vmul.f32 %v2048_v29, %v2048_v29 }
 0xbc9   : > { %v2050_v22 = vsel %vm738_vm0, %v2049_v18, 0.0 }
 0xbca   : > { %2051 = vadd.xlane.f32.xlu1 %v2050_v22 }
 0xbcd   : > { %v3993_v32 = vpop.eup %3992 }
 0xbce   : > { %v2026_v35 = vmul.f32 %v3993_v32, %v2018_v6 }
 0xbd0   : > { %v2027_v37 = vmul.f32 %v4517_v36, %v2026_v35 }
 0xbd1   : > { %v3995_v39 = vpop.eup %3994 }
 0xbd2   : > { %v2041_v41 = vmul.f32 %v3995_v39, %v2033_v45  ;;  %v4855_v46 = vadd.f32 %v4528_v40, %v2027_v37 }
 0xbd4   : > { %3669 = vmatmul.mubr.msk.f32.vlgmr.msra.gmra.mrb[18].mxu1 %vm738_vm0, %v4855_v46  ;;  %v2042_v63 = vmul.f32 %v4517_v36, %v2041_v41 }
 0xbd5   : > { %3852 = vmatpush3.bf16.msra.mxu1 %v4531_v43  ;;  %3679 = vmatprep.mubr.msk.f32.mxu1 %vm4186_vm1, %v4187_v23 }
 0xbd6   : > { %3853 = vmatprep.subr.bf16.mxu1 %v4185_v19  ;;  %v2043_v47 = vadd.f32 %v4528_v40, %v2042_v63 }
 0xbd9   : > { %3855 = vmatpush3.bf16.msra.mxu1 %v4545_v48 }
 0xbda   : > { %3856 = vmatprep.subr.bf16.mxu1 %v4185_v19 }
 0xbdc   : > { %3680 = vmatmul.mubr.msk.f32.vlgmr.msra.gmra.mrb[20].mxu1 %vm738_vm0, %v2043_v47 }
 0xbdd   : > { %3858 = vmatpush3.bf16.msra.mxu1 %v4558_v52  ;;  %3690 = vmatprep.mubr.msk.f32.mxu1 %vm4186_vm1, %v4187_v23 }
 0xbde   : > { %3859 = vmatprep.subr.bf16.mxu1 %v4185_v19 }
 0xbe1   : > { %3861 = vmatpush3.bf16.msra.mxu1 %v4573_v56 }
 0xbe2   : > { %3693 = vmatprep.subr.mxu1 %v4187_v23 }
 0xc57   : > { %v2052_v43 = vpop.xlane.xlu1 %2051 }
 0xc58   : > { %v2053_v54 = vmul.f32 0.03125, %v2052_v43 }
 0xc5a   : > { %v2054_v48 = vadd.f32 1e-05, %v2053_v54 }
 0xc5c   : > { %3996 = vrsqrt.f32 %v2054_v48 }
 0xc66   : > { %v3997_v57 = vpop.eup %3996 }
 0xc67   : > { %v2056_v58 = vmul.f32 %v3997_v57, %v2048_v29 }
 0xc69   : > { %v2057_v62 = vmul.f32 %v4517_v36, %v2056_v58 }
 0xc6b   : > { %v2058_v2 = vadd.f32 %v4528_v40, %v2057_v62 }
 0xc6d   : > { %3691 = vmatmul.mubr.msk.f32.vlgmr.msra.gmra.mrb[22].mxu1 %vm738_vm0, %v2058_v2 }
 0xc6e   : > { %3695 = vmatprep.mubr.msk.f32.mxu1 %vm4186_vm1, %v4187_v23 }
 0xca7   : > { %v2128_v52 = vpop.f32.mrb[18].mxu1 }
 0xca8   : > { %v2129_v56 = vadd.f32 %v4591_v0, %v2128_v52  ;;  %v3670_v3 = vpop.f32.mrb[19].mxu1 }
 0xcaa   : > { %2442 = vrot.lane.b32.xlu1 %v2129_v56, %s4188_s22 }
 0xcaf   : > { %v2201_v5 = vpop.f32.mrb[20].mxu1 }
 0xcb0   : > { %v2202_v6 = vadd.f32 %v4598_v4, %v2201_v5  ;;  %v3681_v7 = vpop.f32.mrb[21].mxu1 }
 0xcb2   : > { %2618 = vrot.lane.b32.xlu1 %v2202_v6, %s4189_s3  ;;  %2444 = vrot.lane.b32.xlu0 %v2202_v6, %s4188_s22 }
 0xcb3   : > { %3694 = vmatpush3.xpose.msk.msra.mxu1 %vm1034_vm2, %v2202_v6 }
 0xcb4   : > { %3698 = vmatprep.subr.mxu1 %v4187_v23 }
 0xcb6   : > { %3696 = vmatmul.mubr.msk.f32.vlgmr.msra.gmra.mrb[24].mxu1 %vm1034_vm2, %v2129_v56  ;;  %2616 = vrot.lane.b32.xlu1 %v2129_v56, %s4189_s3 }
 0xcb7   : > { %2791 = vrot.lane.b32.xlu0 %v2202_v6, %s4190_s19  ;;  %3700 = vmatprep.mubr.msk.f32.mxu1 %vm4186_vm1, %v4187_v23 }
 0xcba   : > { %2789 = vrot.lane.b32.xlu1 %v2129_v56, %s4190_s19 }
 0xd1c   : > { %v2443_v36 = vpop.permute.xlu1 %2442 }
 0xd24   : > { %v2619_v40 = vpop.permute.xlu1 %2618  ;;  %v2445_v0 = vpop.permute.xlu0 %2444 }
 0xd25   : > { %3704 = vmatpush3.xpose.msk.msra.mxu0 %vm1034_vm2, %v2445_v0 }
 0xd26   : > { %3713 = vmatprep.subr.mxu0 %v4187_v23 }
 0xd28   : > { %3706 = vmatmul.mubr.msk.f32.vlgmr.msra.gmra.mrb[10].mxu0 %vm1034_vm2, %v2443_v36  ;;  %v2617_v4 = vpop.permute.xlu1 %2616 }
 0xd29   : > { %3714 = vmatpush3.xpose.msk.msra.mxu0 %vm1034_vm2, %v2619_v40  ;;  %3715 = vmatprep.mubr.msk.f32.mxu0 %vm4186_vm1, %v4187_v23  ;;  %v2792_v9 = vpop.permute.xlu0 %2791 }
 0xd2a   : > { %3723 = vmatprep.subr.mxu0 %v4187_v23 }
 0xd2c   : > { %3716 = vmatmul.mubr.msk.f32.vlgmr.msra.gmra.mrb[12].mxu0 %vm1034_vm2, %v2617_v4  ;;  %v2790_v11 = vpop.permute.xlu1 %2789 }
 0xd2d   : > { %3724 = vmatpush3.xpose.msk.msra.mxu0 %vm1034_vm2, %v2792_v9  ;;  %3725 = vmatprep.mubr.msk.f32.mxu0 %vm4186_vm1, %v4187_v23 }
 0xd2e   : > { %3862 = vmatprep.subr.bf16.mxu0 %v4185_v19 }
 0xd30   : > { %3726 = vmatmul.mubr.msk.f32.vlgmr.msra.gmra.mrb[14].mxu0 %vm1034_vm2, %v2790_v11 }
 0xd31   : > { %3864 = vmatpush3.bf16.msra.mxu0 %v4674_v44  ;;  %3741 = vmatprep.mubr.msk.f32.mxu0 %vm4186_vm1, %v4187_v23 }
 0xd32   : > { %3865 = vmatprep.subr.bf16.mxu0 %v4185_v19 }
 0xd35   : > { %3867 = vmatpush3.bf16.msra.mxu0 %v4683_v49 }
 0xd36   : > { %3874 = vmatprep.subr.bf16.mxu0 %v4185_v19 }
 0xd40   : > { %v2274_v45 = vpop.f32.mrb[22].mxu1 }
 0xd41   : > { %v2275_v1 = vadd.f32 %v4614_v8, %v2274_v45  ;;  %v3692_v13 = vpop.f32.mrb[23].mxu1 }
 0xd43   : > { %3699 = vmatpush3.msra.mxu1 %v2275_v1 }
 0xd44   : > { %3708 = vmatprep.subr.mxu1 %v4187_v23 }
 0xd89   : > { %v2350_v14 = vpop.f32.mrb[24].mxu1 }
 0xd8a   : > { %v3697_v16 = vpop.f32.mrb[25].mxu1  ;;  %v2354_v44 = vsel %vm1034_vm2, %v2350_v14, -inf }
 0xd8b   : > { %2355 = vmax.xlane.f32.xlu0 %v2354_v44 }
 0xdfb   : > { %v2516_v17 = vpop.f32.mrb[10].mxu0 }
 0xdfc   : > { %v3707_v20 = vpop.f32.mrb[11].mxu0  ;;  %v2520_v21 = vsel %vm1034_vm2, %v2516_v17, -inf }
 0xdfd   : > { %2521 = vmax.xlane.f32.xlu1 %v2520_v21 }
 0xdff   : > { %v2690_v49 = vpop.f32.mrb[12].mxu0 }
 0xe00   : > { %v3717_v25 = vpop.f32.mrb[13].mxu0  ;;  %v2694_v26 = vsel %vm1034_vm2, %v2690_v49, -inf }
 0xe01   : > { %2695 = vmax.xlane.f32.xlu0 %v2694_v26 }
 0xe03   : > { %v2863_v8 = vpop.f32.mrb[14].mxu0 }
 0xe04   : > { %v3727_v27 = vpop.f32.mrb[15].mxu0  ;;  %v2867_v28 = vsel %vm1034_vm2, %v2863_v8, -inf }
 0xe05   : > { %2868 = vmax.xlane.f32.xlu0 %v2867_v28 }
 0xe18   : > { %v2356_v53 = vpop.xlane.xlu0 %2355 }
 0xe19   : > { %v2357_v29 = vsub.f32 %v2350_v14, %v2356_v53 }
 0xe1b   : > { %v2358_v18 = vmul.f32 1.442695, %v2357_v29 }
 0xe1d   : > { %3998 = vpow2.f32 %v2358_v18 }
 0xe27   : > { %v3999_v22 = vpop.eup %3998 }
 0xe28   : > { %v2360_v32 = vsel %vm1034_vm2, %v3999_v22, 0.0 }
 0xe29   : > { %2361 = vadd.xlane.f32.xlu0 %v2360_v32 }
 0xe8a   : > { %v2522_v35 = vpop.xlane.xlu1 %2521 }
 0xe8b   : > { %v2523_v37 = vsub.f32 %v2516_v17, %v2522_v35 }
 0xe8d   : > { %v2524_v39 = vmul.f32 1.442695, %v2523_v37 }
 0xe8e   : > { %v2696_v41 = vpop.xlane.xlu0 %2695 }
 0xe8f   : > { %4000 = vpow2.f32 %v2524_v39  ;;  %v2697_v63 = vsub.f32 %v2690_v49, %v2696_v41 }
 0xe91   : > { %v2698_v47 = vmul.f32 1.442695, %v2697_v63 }
 0xe92   : > { %v2869_v58 = vpop.xlane.xlu0 %2868 }
 0xe93   : > { %4002 = vpow2.f32 %v2698_v47  ;;  %v2870_v2 = vsub.f32 %v2863_v8, %v2869_v58 }
 0xe95   : > { %v2871_v52 = vmul.f32 1.442695, %v2870_v2 }
 0xe99   : > { %v4001_v43 = vpop.eup %4000 }
 0xe9a   : > { %v2526_v54 = vsel %vm1034_vm2, %v4001_v43, 0.0 }
 0xe9b   : > { %2527 = vadd.xlane.f32.xlu1 %v2526_v54 }
 0xe9d   : > { %v4003_v48 = vpop.eup %4002 }
 0xe9e   : > { %v2700_v57 = vsel %vm1034_vm2, %v4003_v48, 0.0 }
 0xe9f   : > { %2701 = vadd.xlane.f32.xlu0 %v2700_v57 }
 0xeac   : > { %2708 = vrot.lane.b32.xlu1 %v2275_v1, %s4189_s3  ;;  %s3411_s3 = sshll.u32 %s4317_s1, 7 }
 0xead   : > { %s4982_s2 = scalar_lea.hbm %s5112_s25, %s3411_s3 }
 0xeb5   : > { %2535 = vrot.lane.b32.xlu0 %v2275_v1, %s4188_s22  ;;  %s5111_s22 = sld [smem:[#allocation18_spill]] }
 0xeb6   : > { %v2362_v62 = vpop.xlane.xlu0 %2361 }
 0xeb7   : > { %4004 = vrcp.f32 %v2362_v62 }
 0xeb8   : > { %4006 = vpow2.f32 %v2871_v52 }
 0xebb   : > { %p5113_p5 = scmp.ne.s32.totalorder %s5111_s22, 0 }
 0xec1   : > { %v4005_v56 = vpop.eup %4004 }
 0xec2   : > { %v2364_v3 = vmul.f32 %v4005_v56, %v2362_v62  ;;  %v4007_v36 = vpop.eup %4006 }
 0xec3   : > { %v2873_v40 = vsel %vm1034_vm2, %v4007_v36, 0.0 }
 0xec4   : > { %v2365_v5 = vsub.f32 2.0, %v2364_v3 }
 0xec6   : > { %v2366_v6 = vmul.f32 %v4005_v56, %v2365_v5 }
 0xec8   : > { %v2367_v7 = vmul.f32 %v3999_v22, %v2366_v6 }
 0xeca   : > { %3701 = vmatmul.mubr.msk.f32.vlgmr.msra.gmra.mrb[26].mxu1 %vm1034_vm2, %v2367_v7 }
 0xecb   : > { %3710 = vmatprep.mubr.msk.f32.mxu1 %vm4186_vm1, %v4187_v23 }
 0xed0   : > { %2874 = vadd.xlane.f32.xlu1 %v2873_v40 }
 0xee1   : > { %2881 = vrot.lane.b32.xlu1 %v2275_v1, %s4190_s19  ;;  %s688_s19 = scalar_lea.vmem [#allocation9], %s4467_s15  ;;  %s4195_s15 = smov [#allocation9]  }
 0xee2   : > { %s4114_s18 = sshll.u32 %s4195_s15, 4  ;;  %s4115_s18 = int_to_ptr.vmem [resolvable:$false] %s4114_s18 }
 0xee3   : > { %s4116_s23 = scalar_lea.vmem %s4115_s18, 256 }
 0xf28   : > { %v2528_v0 = vpop.xlane.xlu1 %2527 }
 0xf29   : > { %4008 = vrcp.f32 %v2528_v0 }
 0xf2c   : > { %v2702_v4 = vpop.xlane.xlu0 %2701  ;;  %v2709_v21 = vpop.permute.xlu1 %2708 }
 0xf2d   : > { %4010 = vrcp.f32 %v2702_v4 }
 0xf30   : > { %v2536_v9 = vpop.permute.xlu0 %2535 }
 0xf31   : > { %3709 = vmatpush3.msra.mxu1 %v2536_v9 }
 0xf32   : > { %3718 = vmatprep.subr.mxu1 %v4187_v23 }
 0xf33   : > { %v4009_v11 = vpop.eup %4008 }
 0xf34   : > { %v2530_v45 = vmul.f32 %v4009_v11, %v2528_v0 }
 0xf36   : > { %v2531_v13 = vsub.f32 2.0, %v2530_v45 }
 0xf37   : > { %v4011_v14 = vpop.eup %4010 }
 0xf38   : > { %v2532_v16 = vmul.f32 %v4009_v11, %v2531_v13  ;;  %v2704_v44 = vmul.f32 %v4011_v14, %v2702_v4 }
 0xf3a   : > { %v2533_v17 = vmul.f32 %v4001_v43, %v2532_v16  ;;  %v2705_v20 = vsub.f32 2.0, %v2704_v44 }
 0xf3c   : > { %v2706_v49 = vmul.f32 %v4011_v14, %v2705_v20  ;;  %3711 = vmatmul.mubr.msk.f32.vlgmr.msra.gmra.mrb[28].mxu1 %vm1034_vm2, %v2533_v17 }
 0xf3d   : > { %3719 = vmatpush3.msra.mxu1 %v2709_v21  ;;  %3720 = vmatprep.mubr.msk.f32.mxu1 %vm4186_vm1, %v4187_v23 }
 0xf3e   : > { %v2707_v1 = vmul.f32 %v4003_v48, %v2706_v49  ;;  %3728 = vmatprep.subr.mxu1 %v4187_v23 }
 0xf40   : > { %3721 = vmatmul.mubr.msk.f32.vlgmr.msra.gmra.mrb[30].mxu1 %vm1034_vm2, %v2707_v1 }
 0xf41   : > { %3730 = vmatprep.mubr.msk.f32.mxu1 %vm4186_vm1, %v4187_v23 }
 0xf5d   : > { %v2875_v25 = vpop.xlane.xlu1 %2874 }
 0xf5e   : > { %4012 = vrcp.f32 %v2875_v25 }
 0xf61   : > { %v2882_v26 = vpop.permute.xlu1 %2881 }
 0xf62   : > { %3729 = vmatpush3.msra.mxu1 %v2882_v26 }
 0xf63   : > { %3868 = vmatprep.subr.bf16.mxu1 %v4185_v19 }
 0xf68   : > { %v4013_v8 = vpop.eup %4012 }
 0xf69   : > { %v2877_v27 = vmul.f32 %v4013_v8, %v2875_v25 }
 0xf6b   : > { %v2878_v28 = vsub.f32 2.0, %v2877_v27 }
 0xf6d   : > { %v2879_v53 = vmul.f32 %v4013_v8, %v2878_v28 }
 0xf6f   : > { %v2880_v29 = vmul.f32 %v4007_v36, %v2879_v53 }
 0xf71   : > { %3731 = vmatmul.mubr.msk.f32.vlgmr.msra.gmra.mrb[32].mxu1 %vm1034_vm2, %v2880_v29 }
 0xf72   : > { %3870 = vmatpush3.bf16.msra.mxu1 %v4714_v12  ;;  %3752 = vmatprep.mubr.msk.f32.mxu1 %vm4186_vm1, %v4187_v23 }
 0xf73   : > { %3871 = vmatprep.subr.bf16.mxu1 %v4185_v19 }
 0xf76   : > { %3873 = vmatpush3.bf16.msra.mxu1 %v4724_v15 }
 0xf9d   : > { %v2437_v18 = vpop.f32.mrb[26].mxu1 }
 0xf9e   : > { %2441 = vst.msk [vmem:[#allocation2] sm:$0xff] %vm1034_vm2, %v2437_v18  ;;  %v3702_v22 = vpop.f32.mrb[27].mxu1 }
0x100f   : > { %v2607_v32 = vpop.f32.mrb[28].mxu1 }
0x1010   : > { %2612 = vrot.lane.b32.xlu1 %v2607_v32, %s4191_s24  ;;  %v3712_v35 = vpop.f32.mrb[29].mxu1  ;;  %s3239_s24 = sshll.u32 %s688_s19, 4  ;;  %s4984_s24 = int_to_ptr.vmem [resolvable:$true] %s3239_s24 }
0x1011   : > { %s4110_s1 = scalar_lea.vmem %s4984_s24, 128  ;;  %p4117_p6 = scmp.lt.s32.totalorder %s4984_s24, %s4115_s18 }
0x1012   : > { %p4111_p10 = scmp.ne.s32.totalorder %s4984_s24, %s4110_s1  ;;  %p4118_p12 = scmp.lt.s32.totalorder %s4116_s23, %s4110_s1 }
0x1013   : > { %v2780_v37 = vpop.f32.mrb[30].mxu1 }
0x1014   : > { %2785 = vrot.lane.b32.xlu0 %v2780_v37, %s4192_s6  ;;  %v3722_v39 = vpop.f32.mrb[31].mxu1  ;;  %p4112_p7 = pnand %p4111_p10, %p5113_p5  ;;  %p4119_p0 = por %p4118_p12, %p4117_p6 }
0x1016   : > { %p4113_p9 = pneg %p4112_p7 }
0x1018   : > { %p4120_p8 = pnand %p4119_p0, %p4113_p9 }
0x1044   : > { %v2953_v12 = vpop.f32.mrb[32].mxu1 }
0x1045   : > { %2958 = vrot.lane.b32.xlu1 %v2953_v12, %s4193_s0  ;;  %v3732_v41 = vpop.f32.mrb[33].mxu1 }
0x1082   : > { %v2613_v63 = vpop.permute.xlu1 %2612 }
0x1083   : > { %2615 = vst.msk [vmem:[#allocation2] sm:$0xff] %vm1372_vm3, %v2613_v63 }
0x1086   : > { %v2786_v15 = vpop.permute.xlu0 %2785 }
0x1087   : > { %2788 = vst.msk [vmem:[#allocation2] sm:$0xff] %vm1546_vm4, %v2786_v15 }
0x10b7   : > { %v2959_v47 = vpop.permute.xlu1 %2958 }
0x10b8   : > { %2961 = vst.msk [vmem:[#allocation2] sm:$0xff] %vm1720_vm5, %v2959_v47 }
0x10bf   : > { %v2962_v43 = vld [vmem:[#allocation2] sm:$0xff] }
0x10c0   : > { %3742 = vmatmul.mubr.msk.f32.vlgmr.msra.gmra.mrb[16].mxu0 %vm738_vm0, %v2962_v43 }
0x10c1   : > { %3876 = vmatpush3.bf16.msra.mxu0 %v4753_v30  ;;  %3787 = vmatprep.mubr.msk.f32.mxu0 %vm4186_vm1, %v4187_v23 }
0x10c2   : > { %3877 = vmatprep.subr.bf16.mxu0 %v4185_v19 }
0x10c5   : > { %3879 = vmatpush3.bf16.msra.mxu0 %v4763_v31 }
0x10c6   : > { %3880 = vmatprep.subr.bf16.mxu0 %v4185_v19 }
0x10c9   : > { %3882 = vmatpush3.bf16.msra.mxu0 %v4773_v34 }
0x10ca   : > { %3883 = vmatprep.subr.bf16.mxu0 %v4185_v19 }
0x10cd   : > { %3885 = vmatpush3.bf16.msra.mxu0 %v4783_v38 }
0x10ce   : > { %3886 = vmatprep.subr.bf16.mxu0 %v4185_v19 }
0x10d1   : > { %3888 = vmatpush3.bf16.msra.mxu0 %v4793_v42 }
0x10d2   : > { %3889 = vmatprep.subr.bf16.mxu0 %v4185_v19 }
0x10d5   : > { %3891 = vmatpush3.bf16.msra.mxu0 %v4803_v50 }
0x10d6   : > { %3892 = vmatprep.subr.bf16.mxu0 %v4185_v19 }
0x10d9   : > { %3894 = vmatpush3.bf16.msra.mxu0 %v4813_v55 }
0x10da   : > { %3895 = vmatprep.subr.bf16.mxu0 %v4185_v19 }
0x10dd   : > { %3897 = vmatpush3.bf16.msra.mxu0 %v4823_v60 }
0x1193   : > { %v3032_v23 = vpop.f32.mrb[16].mxu0 }
0x1194   : > { %v3033_v30 = vadd.f32 %v4698_v59, %v3032_v23  ;;  %v3743_v31 = vpop.f32.mrb[17].mxu0 }
0x1196   : > { %v3036_v34 = vadd.f32 %v3033_v30, %v4855_v46 }
0x1198   : > { %v3037_v38 = vsel %vm738_vm0, %v3036_v34, 0.0 }
0x1199   : > { %3038 = vadd.xlane.f32.xlu0 %v3037_v38 }
0x1226   : > { %v3039_v42 = vpop.xlane.xlu0 %3038 }
0x1227   : > { %v3040_v54 = vmul.f32 0.03125, %v3039_v42 }
0x1229   : > { %v3041_v50 = vsub.f32 %v3036_v34, %v3040_v54 }
0x122b   : > { %v3042_v48 = vmul.f32 %v3041_v50, %v3041_v50 }
0x122d   : > { %v3043_v57 = vsel %vm738_vm0, %v3042_v48, 0.0 }
0x122e   : > { %3044 = vadd.xlane.f32.xlu1 %v3043_v57 }
0x12bb   : > { %v3045_v55 = vpop.xlane.xlu1 %3044 }
0x12bc   : > { %v3046_v19 = vmul.f32 0.03125, %v3045_v55 }
0x12be   : > { %v3047_v58 = vadd.f32 1e-05, %v3046_v19 }
0x12c0   : > { %4014 = vrsqrt.f32 %v3047_v58 }
0x12ca   : > { %v4015_v60 = vpop.eup %4014 }
0x12cb   : > { %v3049_v62 = vmul.f32 %v4015_v60, %v3041_v50 }
0x12cd   : > { %v3050_v59 = vmul.f32 %v4731_v24, %v3049_v62 }
0x12cf   : > { %v3051_v46 = vadd.f32 %v4736_v10, %v3050_v59 }
0x12d1   : > { %3753 = vmatmul.mubr.msk.f32.vlgmr.msra.gmra.mrb[34].mxu1 %vm738_vm0, %v3051_v46 }
0x13a4   : > { %v3121_v2 = vpop.f32.mrb[34].mxu1 }
0x13a5   : > { %v3122_v52 = vadd.f32 %v4830_v61, %v3121_v2  ;;  %v3754_v56 = vpop.f32.mrb[35].mxu1 }
0x13a7   : > { %v3126_v3 = vmul.f32 0.70710677, %v3122_v52  ;;  %v3125_v1 = vmul.f32 0.5, %v3122_v52 }
0x13a9   : > { %v3129_v5 = vand.u32 2147483647, %v3126_v3  ;;  %vm3127_vm7 = vcmp.ge.f32.partialorder %v3126_v3, 0.0 }
0x13aa   : > { %v3128_v21 = vsel %vm3127_vm7, 1.0, %v4194_v33 }
0x13ab   : > { %v3130_v6 = vmul.f32 0.3275911, %v3129_v5  ;;  %v3143_v36 = vsub.f32 0.0, %v3129_v5 }
0x13ad   : > { %v3131_v7 = vadd.f32 1.0, %v3130_v6  ;;  %v3144_v0 = vmul.f32 %v3143_v36, %v3129_v5 }
0x13af   : > { %4016 = vrcp.f32 %v3131_v7  ;;  %v3145_v11 = vmul.f32 1.442695, %v3144_v0 }
0x13b1   : > { %4018 = vpow2.f32 %v3145_v11 }
0x13b9   : > { %v4017_v40 = vpop.eup %4016 }
0x13ba   : > { %v3134_v4 = vmul.f32 1.0614054, %v4017_v40 }
0x13bb   : > { %v4019_v44 = vpop.eup %4018 }
0x13bc   : > { %v3135_v9 = vadd.f32 -1.4531521, %v3134_v4 }
0x13be   : > { %v3136_v24 = vmul.f32 %v4017_v40, %v3135_v9 }
0x13c0   : > { %v3137_v45 = vadd.f32 1.4214138, %v3136_v24 }
0x13c2   : > { %v3138_v10 = vmul.f32 %v4017_v40, %v3137_v45 }
0x13c4   : > { %v3139_v13 = vadd.f32 -0.28449672, %v3138_v10 }
0x13c6   : > { %v3140_v61 = vmul.f32 %v4017_v40, %v3139_v13 }
0x13c8   : > { %v3141_v14 = vadd.f32 0.2548296, %v3140_v61 }
0x13ca   : > { %v3142_v16 = vmul.f32 %v4017_v40, %v3141_v14 }
0x13cc   : > { %v3147_v17 = vmul.f32 %v4019_v44, %v3142_v16 }
0x13ce   : > { %v3148_v20 = vsub.f32 1.0, %v3147_v17 }
0x13d0   : > { %v3149_v49 = vmul.f32 %v3148_v20, %v3128_v21 }
0x13d2   : > { %v3150_v25 = vadd.f32 1.0, %v3149_v49 }
0x13d4   : > { %v3151_v26 = vmul.f32 %v3150_v25, %v3125_v1 }
0x13d6   : > { %3788 = vmatmul.mubr.f32.vlgmr.msra.gmra.mrb[18].mxu0 %v3151_v26 }
0x14a9   : > { %v3218_v8 = vpop.f32.mrb[18].mxu0 }
0x14aa   : > { %v3222_v27 = vadd.f32 %v3218_v8, %v3036_v34  ;;  %v3789_v28 = vpop.f32.mrb[19].mxu0 }
0x14ac   : > { %v3223_v53 = vadd.f32 %v4839_v51, %v3222_v27 }
0x14ae   : > { %3224 = vst.msk [vmem:[%s688_s19] sm:$0xff] %vm738_vm0, %v3223_v53 }
0x14af   : > { %4123 = shalt.err (!%p4120_p8)
}
0x14b0   : > { %s4124_s17 = scalar_lea.hbm %s4982_s2, 128  ;;  %s4128_s21 = scalar_lea.hbm %s5112_s25, 256 }
0x14b1   : > { %p4125_p13 = scmp.ne.s32.totalorder %s4982_s2, %s4124_s17  ;;  %p4129_p3 = scmp.lt.u32.totalorder %s4982_s2, %s5112_s25 }
0x14b2   : > { %p4130_p4 = scmp.lt.u32.totalorder %s4128_s21, %s4124_s17  ;;  %p4132_p10 = scmp.lt.u32.totalorder %s4124_s17, %s4982_s2 }
0x14b3   : > { %p4126_p11 = pnand %p4125_p13, %p5113_p5 }
0x14b4   : > { %p4131_p2 = por %p4130_p4, %p4129_p3 }
0x14b5   : > { %p4127_p1 = pneg %p4126_p11 }
0x14b6   : > { %p4133_p7 = por %p4132_p10, %p4131_p2 }
0x14b8   : > { %p4134_p9 = pnand %p4133_p7, %p4127_p1 }
0x14ba   : > { %4137 = shalt.err (!%p4134_p9)
}
0x14bb   : > { %3904 = dma.vmem_to_hbm [thread:$0]  (%p5113_p5), %s4984_s24, 128, %s4982_s2, %s3226_s16  }
0x14bc PF: > { %s5114_s19 = sld [smem:[#allocation13_spill]]  ;;  %s5115_s6 = sld [smem:[#allocation19_spill]] }
0x14bd   : > { %s5116_s0 = sld [smem:[#allocation15_spill]] }
0x14c2   : > { %s3251_s1 = sand.u32 1, %s5114_s19   ;;  %p5117_p6 = scmp.ne.s32.totalorder %s5115_s6, 0 }
0x14c3   : > { %p5118_p12 = scmp.ge.s32.totalorder %s5116_s0, 2  ;;  %s3252_s15 = scalar_lea.sflag [#allocation5], %s3251_s1 }
0x14c5   : > { %p3917_p0 = pnand %p5118_p12, %p5117_p6 }
0x14c7   : > { %4163 = dma.done.wait (!%p3917_p0), %s3252_s15, 128  }
0x14c8   : > { %4165 = vsyncadd (!%p3917_p0), %s3252_s15, 4294967168  ;;  %s5119_s21 = sld [smem:[#allocation16_spill]]  ;;  %s5120_s18 = sld [smem:[#allocation14_spill]] }
0x14c9   : > { %s5121_s20 = sld [smem:[#allocation17_spill]]  ;;  %s5122_s0 = smov %s4172_s30 }
0x14ce   : > { %p35_p8 = scmp.ge.s32.totalorder %s5119_s21, 4   ;;  %s5123_s30 = smov %s5120_s18 }
0x14d0   :  { %37 = sbr.rel (!%p35_p8) target bundleno = 19 (0x13), region = 165 }
0x14d7   :  { %3257 = vsyncpa [#allocation4], 1 }
0x14d8   :  { %3259 = vsyncpa [#allocation4 + $0x1], 1 }
0x14d9   :  { %3260 = vsyncpa [#allocation7], 1 }
0x14da   :  { %3262 = vsyncpa [#allocation7 + $0x1], 1 }
0x14db   :  { %3263 = vsyncpa [#allocation5], 1 }
0x14dc   :  { %3265 = vsyncpa [#allocation5 + $0x1], 1 }

</bundles_post_ra>
